<compile_context>
chip_gen: v5e
topology: v5e:2x2
jax: 0.10.0
libtpu: 0.0.40
codegen_flags: <defaults>
</compile_context>

<pallas_src>
import math
from functools import partial

import jax
import jax.numpy as jnp
import numpy as np
from jax import lax
from jax.experimental import pallas as pl
from jax.experimental.pallas import tpu as pltpu

EXPANSION = 4
EPS = 1e-5


# ----------------------------------------------------------------------------
# In-kernel helpers
# ----------------------------------------------------------------------------
def _mm(a, w):
    """MXU matmul: bf16 inputs, f32 accumulation."""
    if a.dtype != jnp.bfloat16:
        a = a.astype(jnp.bfloat16)
    return jnp.dot(a, w, preferred_element_type=jnp.float32)


def _shift_rows(v, delta, fill=0.0):
    """shift(v, d)[i] = v[i - d] along axis 0; vacated rows filled with `fill`.

    Uses an XLU sublane rotate (pltpu.roll) + VPU select when the row count is
    8-aligned; tiny concat fallback otherwise (only the <8-row tail stages).
    """
    if delta == 0:
        return v
    n = v.shape[0]
    d = abs(delta)
    if d >= n:
        return jnp.full_like(v, fill)
    if n % 8 == 0:
        rows = lax.broadcasted_iota(jnp.int32, v.shape, 0)
        rolled = pltpu.roll(v, shift=delta % n, axis=0)
        if delta > 0:
            return jnp.where(rows < d, fill, rolled)
        return jnp.where(rows >= n - d, fill, rolled)
    pad = jnp.full((d,) + v.shape[1:], fill, v.dtype)
    if delta > 0:
        return jnp.concatenate([pad, v[: n - d]], axis=0)
    return jnp.concatenate([v[d:], pad], axis=0)


def _row_gather(vb, rows, stride, offset):
    """out[p] = v[stride * p + offset]; out-of-range indices give zero rows.

    Row selection as a tiny 0/1 matmul on the (otherwise idle) MXU: implements
    the stride-2 even/odd split, the stride-2 k=3 tap gather and the maxpool
    downsample without value reshapes or strided value slices.
    `vb` must already be bf16 (so the selection is exact).
    """
    n = vb.shape[0]
    p = lax.broadcasted_iota(jnp.int32, (rows, n), 0)
    i = lax.broadcasted_iota(jnp.int32, (rows, n), 1)
    sel = jnp.where(i == stride * p + offset, 1.0, 0.0).astype(jnp.bfloat16)
    return jnp.dot(sel, vb, preferred_element_type=jnp.float32)


def _bottleneck(x, stride, has_ds, w):
    """One Bottleneck block on an in-VMEM/vreg activation value (L, Cin)."""
    if has_ds:
        w1, b1, w2, b2, w3, b3, wd, bd = w
    else:
        assert stride == 1, "stride-2 Bottleneck requires a downsample branch"
        w1, b1, w2, b2, w3, b3 = w
        wd = bd = None

    L = x.shape[0]
    xb = x.astype(jnp.bfloat16)                      # cast once per block input
    # conv1 (1x1) + bn1 + relu (full resolution)
    h1 = jnp.maximum(_mm(xb, w1[...]) + b1[...], 0.0)

    if stride == 1:
        # conv2 (k=3, s=1, p=1): 3 row-shifted matmuls (XLU roll + mask).
        acc = _mm(h1, w2[1])
        acc += _mm(_shift_rows(h1, 1), w2[0])         # h1[p-1]
        acc += _mm(_shift_rows(h1, -1), w2[2])        # h1[p+1]
        identity = (_mm(xb, wd[...]) + bd[...]) if has_ds else x
    else:
        assert L % 2 == 0, "stride-2 block expects even length"
        Lh = L // 2
        h1b = h1.astype(jnp.bfloat16)
        # conv2 (k=3, s=2, p=1): taps h1[2p-1], h1[2p], h1[2p+1] via MXU gather
        acc = _mm(_row_gather(h1b, Lh, 2, -1), w2[0])
        acc += _mm(_row_gather(h1b, Lh, 2, 0), w2[1])
        acc += _mm(_row_gather(h1b, Lh, 2, 1), w2[2])
        # downsample: 1x1 stride-2 conv on x (pick even rows, then matmul)
        identity = _mm(_row_gather(xb, Lh, 2, 0), wd[...]) + bd[...]

    h2 = jnp.maximum(acc + b2[...], 0.0)
    y = _mm(h2, w3[...]) + b3[...]                   # conv3 (1x1) + bn3
    return jnp.maximum(y + identity, 0.0)


def _make_fused_kernel(cfg):
    """Whole network (stem -> maxpool -> all blocks -> avgpool), one batch
    element per grid step.  `cfg` = static tuple of (stride, has_downsample)."""

    def kernel(*refs):
        it = iter(refs)
        xg_ref = next(it)            # (1, Lh, 7*12) im2col'd stem input
        sw_ref = next(it)            # (84, C0) wide stem weight (BN folded)
        sb_ref = next(it)            # (1, C0)
        blk_refs = []
        for _, has_ds in cfg:
            n = 8 if has_ds else 6
            blk_refs.append(tuple(next(it) for _ in range(n)))
        o_ref = next(it)

        # stem: conv1d(12->C0, k=7, s=2, p=3) + BN + ReLU == ONE wide-K matmul
        s = jnp.maximum(_mm(xg_ref[0], sw_ref[...]) + sb_ref[...], 0.0)

        # maxpool(k=3, s=2, p=1): full-res window max, then pick even rows
        m = jnp.maximum(jnp.maximum(s, _shift_rows(s, 1, fill=-jnp.inf)),
                        _shift_rows(s, -1, fill=-jnp.inf))
        x = _row_gather(m.astype(jnp.bfloat16), m.shape[0] // 2, 2, 0)

        # bottleneck stack: weights VMEM-resident, activations never hit HBM
        for (stride, has_ds), w in zip(cfg, blk_refs):
            x = _bottleneck(x, stride, has_ds, w)

        # adaptive avg pool over L
        o_ref[0] = jnp.mean(x, axis=0, keepdims=True)

    return kernel


# ----------------------------------------------------------------------------
# pallas_call plumbing
# ----------------------------------------------------------------------------
def _wspec(shape):
    """Whole array, constant block index -> stays resident across grid steps."""
    nd = len(shape)
    return pl.BlockSpec(tuple(shape), lambda b, _nd=nd: (0,) * _nd)


def _fold_bn(w, bn):
    """Fold eval-mode BN into the conv weight.

    w: (Cout, Cin, K) -> (K, Cin, Cout) bf16 folded weight, (1, Cout) f32 bias.
    """
    scale = bn["gamma"] * lax.rsqrt(bn["var"] + EPS)
    bias = bn["beta"] - bn["mean"] * scale
    wf = (w * scale[:, None, None]).transpose(2, 1, 0)
    return wf.astype(jnp.bfloat16), bias.reshape(1, -1).astype(jnp.float32)


def resnet_forward(params, x):
    """x: (B, L, 12) channels-last (the module transposes NLC->NCL; we keep NLC
    so every conv is a lane-contiguous MXU matmul).  One pallas_call total."""
    B, L, cin = x.shape
    assert cin == 12 and L % 4 == 0, "stem+maxpool expect L % 4 == 0"

    # Stem: fold BN, wide-K weight; im2col the 7 stride-2 taps in the wrapper
    # (one cheap XLA op on the tiny input; pad=3 handled here).
    sw, sb = _fold_bn(params["conv1_w"], params["bn1"])     # (7, 12, C0), (1, C0)
    k7, _, c0 = sw.shape
    lh = L // 2
    xp = jnp.pad(x, ((0, 0), (3, 3), (0, 0)))
    xg = jnp.concatenate([xp[:, k: k + L: 2, :] for k in range(k7)], axis=-1)

    args = [xg, sw.reshape(k7 * cin, c0), sb]
    cfg = []
    l_cur = lh // 2                                         # after maxpool
    for layer in params["layers"]:
        for p_blk in layer:
            stride = p_blk["stride"]
            has_ds = p_blk["downsample"] is not None
            if stride != 1:
                assert has_ds, "stride-2 block must have a downsample"
                assert l_cur % 2 == 0, "stride-2 block expects even length"
            w1, b1 = _fold_bn(p_blk["conv1_w"], p_blk["bn1"])
            w2, b2 = _fold_bn(p_blk["conv2_w"], p_blk["bn2"])
            w3, b3 = _fold_bn(p_blk["conv3_w"], p_blk["bn3"])
            args += [w1[0], b1, w2, b2, w3[0], b3]          # 1x1 convs as 2-D mats
            if has_ds:
                wd, bd = _fold_bn(p_blk["downsample"]["w"],
                                  p_blk["downsample"]["bn"])
                args += [wd[0], bd]
            cfg.append((stride, has_ds))
            l_cur //= stride
    c_final = params["layers"][-1][-1]["conv3_w"].shape[0]

    in_specs = [pl.BlockSpec((1, lh, k7 * cin), lambda b: (b, 0, 0))]
    in_specs += [_wspec(a.shape) for a in args[1:]]

    out = pl.pallas_call(
        _make_fused_kernel(tuple(cfg)),
        out_shape=jax.ShapeDtypeStruct((B, 1, c_final), jnp.float32),
        grid=(B,),
        in_specs=in_specs,
        out_specs=pl.BlockSpec((1, 1, c_final), lambda b: (b, 0, 0)),
        compiler_params=pltpu.CompilerParams(
            dimension_semantics=("parallel",)),  # megacore / v7x 2-TC over batch
    )(*args)
    return out.reshape(B, c_final)


# ----------------------------------------------------------------------------
# Parameter initialization (kaiming-normal fan_out, BN eval defaults)
# ----------------------------------------------------------------------------
def _kaiming(key, shape):
    cout, _, k = shape
    std = math.sqrt(2.0 / (cout * k))
    return std * jax.random.normal(key, shape, dtype=jnp.float32)


def _init_bn(c):
    return dict(
        gamma=jnp.ones((c,), jnp.float32),
        beta=jnp.zeros((c,), jnp.float32),
        mean=jnp.zeros((c,), jnp.float32),
        var=jnp.ones((c,), jnp.float32),
    )


def _init_bottleneck(key, inplanes, planes, stride):
    k1, k2, k3, k4 = jax.random.split(key, 4)
    p = dict(
        conv1_w=_kaiming(k1, (planes, inplanes, 1)),
        bn1=_init_bn(planes),
        conv2_w=_kaiming(k2, (planes, planes, 3)),
        bn2=_init_bn(planes),
        conv3_w=_kaiming(k3, (planes * EXPANSION, planes, 1)),
        bn3=_init_bn(planes * EXPANSION),
        stride=stride,
        downsample=None,
    )
    if stride != 1 or inplanes != planes * EXPANSION:
        p["downsample"] = dict(
            w=_kaiming(k4, (planes * EXPANSION, inplanes, 1)),
            bn=_init_bn(planes * EXPANSION),
        )
    return p


def init_resnet(key, planes_list, blocks_list):
    keys = jax.random.split(key, 1 + sum(blocks_list))
    params = dict(
        conv1_w=_kaiming(keys[0], (planes_list[0], 12, 7)),
        bn1=_init_bn(planes_list[0]),
        layers=[],
    )
    inplanes = planes_list[0]
    ki = 1
    for li, (planes, nblocks) in enumerate(zip(planes_list, blocks_list)):
        stride = 1 if li == 0 else 2
        layer = [_init_bottleneck(keys[ki], inplanes, planes, stride)]
        ki += 1
        inplanes = planes * EXPANSION
        for _ in range(1, nblocks):
            layer.append(_init_bottleneck(keys[ki], inplanes, planes, 1))
            ki += 1
        params["layers"].append(layer)
    return params


# ----------------------------------------------------------------------------
# Pure-JAX reference (same folded bf16 weights -> matching numerics)
# ----------------------------------------------------------------------------
def _conv_ref(x_ncl, wf, bias, stride, pad):
    w = wf.transpose(2, 1, 0)                        # (Cout, Cin, K) bf16
    y = lax.conv_general_dilated(
        x_ncl.astype(jnp.bfloat16), w, (stride,), [(pad, pad)],
        dimension_numbers=("NCH", "OIH", "NCH"),
        preferred_element_type=jnp.float32)
    return y + bias.reshape(1, -1, 1)


def _bottleneck_ref(x, p):
    stride = p["stride"]
    w1, b1 = _fold_bn(p["conv1_w"], p["bn1"])
    w2, b2 = _fold_bn(p["conv2_w"], p["bn2"])
    w3, b3 = _fold_bn(p["conv3_w"], p["bn3"])
    if p["downsample"] is not None:
        wd, bd = _fold_bn(p["downsample"]["w"], p["downsample"]["bn"])
        identity = _conv_ref(x, wd, bd, stride, 0)
    else:
        identity = x
    out = jnp.maximum(_conv_ref(x, w1, b1, 1, 0), 0.0)
    out = jnp.maximum(_conv_ref(out, w2, b2, stride, 1), 0.0)
    out = _conv_ref(out, w3, b3, 1, 0)
    return jnp.maximum(out + identity, 0.0)


def resnet_ref(params, x):
    x = x.transpose(0, 2, 1)                         # NLC -> NCL
    w, b = _fold_bn(params["conv1_w"], params["bn1"])
    x = jnp.maximum(_conv_ref(x, w, b, 2, 3), 0.0)
    x = lax.reduce_window(x, -jnp.inf, lax.max,
                          (1, 1, 3), (1, 1, 2), [(0, 0), (0, 0), (1, 1)])
    for layer in params["layers"]:
        for block in layer:
            x = _bottleneck_ref(x, block)
    return jnp.mean(x, axis=2)


# ----------------------------------------------------------------------------
# Main
# ----------------------------------------------------------------------------
if __name__ == "__main__":
    key = jax.random.PRNGKey(0)
    k_params, k_x = jax.random.split(key)

    planes = [4, 8, 16, 32]
    blocks = [2, 1, 1, 1]
    params = init_resnet(k_params, planes, blocks)

    B, L, C_IN = 2, 64, 12
    x = jax.random.normal(k_x, (B, L, C_IN), dtype=jnp.float32)

    fwd = jax.jit(partial(resnet_forward, params))
    out = jax.block_until_ready(fwd(x))

    ref = jax.block_until_ready(jax.jit(partial(resnet_ref, params))(x))

    assert out.shape == (B, planes[-1] * EXPANSION), out.shape
    np.testing.assert_allclose(np.asarray(out), np.asarray(ref),
                               rtol=2e-2, atol=2e-2)

    print("KERNEL_OK")
</pallas_src>

<mosaic_0001>
module attributes {stable_mosaic.version = 11 : i64} {
  func.func @kernel(%arg0: i32, %arg1: memref<1x32x84xf32, #tpu.memory_space<vmem>>, %arg2: memref<84x4xbf16, #tpu.memory_space<vmem>>, %arg3: memref<1x4xf32, #tpu.memory_space<vmem>>, %arg4: memref<4x4xbf16, #tpu.memory_space<vmem>>, %arg5: memref<1x4xf32, #tpu.memory_space<vmem>>, %arg6: memref<3x4x4xbf16, #tpu.memory_space<vmem>>, %arg7: memref<1x4xf32, #tpu.memory_space<vmem>>, %arg8: memref<4x16xbf16, #tpu.memory_space<vmem>>, %arg9: memref<1x16xf32, #tpu.memory_space<vmem>>, %arg10: memref<4x16xbf16, #tpu.memory_space<vmem>>, %arg11: memref<1x16xf32, #tpu.memory_space<vmem>>, %arg12: memref<16x4xbf16, #tpu.memory_space<vmem>>, %arg13: memref<1x4xf32, #tpu.memory_space<vmem>>, %arg14: memref<3x4x4xbf16, #tpu.memory_space<vmem>>, %arg15: memref<1x4xf32, #tpu.memory_space<vmem>>, %arg16: memref<4x16xbf16, #tpu.memory_space<vmem>>, %arg17: memref<1x16xf32, #tpu.memory_space<vmem>>, %arg18: memref<16x8xbf16, #tpu.memory_space<vmem>>, %arg19: memref<1x8xf32, #tpu.memory_space<vmem>>, %arg20: memref<3x8x8xbf16, #tpu.memory_space<vmem>>, %arg21: memref<1x8xf32, #tpu.memory_space<vmem>>, %arg22: memref<8x32xbf16, #tpu.memory_space<vmem>>, %arg23: memref<1x32xf32, #tpu.memory_space<vmem>>, %arg24: memref<16x32xbf16, #tpu.memory_space<vmem>>, %arg25: memref<1x32xf32, #tpu.memory_space<vmem>>, %arg26: memref<32x16xbf16, #tpu.memory_space<vmem>>, %arg27: memref<1x16xf32, #tpu.memory_space<vmem>>, %arg28: memref<3x16x16xbf16, #tpu.memory_space<vmem>>, %arg29: memref<1x16xf32, #tpu.memory_space<vmem>>, %arg30: memref<16x64xbf16, #tpu.memory_space<vmem>>, %arg31: memref<1x64xf32, #tpu.memory_space<vmem>>, %arg32: memref<32x64xbf16, #tpu.memory_space<vmem>>, %arg33: memref<1x64xf32, #tpu.memory_space<vmem>>, %arg34: memref<64x32xbf16, #tpu.memory_space<vmem>>, %arg35: memref<1x32xf32, #tpu.memory_space<vmem>>, %arg36: memref<3x32x32xbf16, #tpu.memory_space<vmem>>, %arg37: memref<1x32xf32, #tpu.memory_space<vmem>>, %arg38: memref<32x128xbf16, #tpu.memory_space<vmem>>, %arg39: memref<1x128xf32, #tpu.memory_space<vmem>>, %arg40: memref<64x128xbf16, #tpu.memory_space<vmem>>, %arg41: memref<1x128xf32, #tpu.memory_space<vmem>>, %arg42: memref<1x1x128xf32, #tpu.memory_space<vmem>>) attributes {dimension_semantics = [#tpu.dimension_semantics<parallel>], iteration_bounds = array<i64: 2>, scalar_prefetch = 0 : i64, scratch_operands = 0 : i64, tpu.core_type = #tpu.core_type<tc>, window_params = [{transform_indices = @transform_0, window_bounds = array<i64: 1, 32, 84>}, {pipeline_mode = #tpu.pipeline_mode<synchronous>, transform_indices = @transform_1, window_bounds = array<i64: 84, 4>}, {pipeline_mode = #tpu.pipeline_mode<synchronous>, transform_indices = @transform_2, window_bounds = array<i64: 1, 4>}, {pipeline_mode = #tpu.pipeline_mode<synchronous>, transform_indices = @transform_3, window_bounds = array<i64: 4, 4>}, {pipeline_mode = #tpu.pipeline_mode<synchronous>, transform_indices = @transform_4, window_bounds = array<i64: 1, 4>}, {pipeline_mode = #tpu.pipeline_mode<synchronous>, transform_indices = @transform_5, window_bounds = array<i64: 3, 4, 4>}, {pipeline_mode = #tpu.pipeline_mode<synchronous>, transform_indices = @transform_6, window_bounds = array<i64: 1, 4>}, {pipeline_mode = #tpu.pipeline_mode<synchronous>, transform_indices = @transform_7, window_bounds = array<i64: 4, 16>}, {pipeline_mode = #tpu.pipeline_mode<synchronous>, transform_indices = @transform_8, window_bounds = array<i64: 1, 16>}, {pipeline_mode = #tpu.pipeline_mode<synchronous>, transform_indices = @transform_9, window_bounds = array<i64: 4, 16>}, {pipeline_mode = #tpu.pipeline_mode<synchronous>, transform_indices = @transform_10, window_bounds = array<i64: 1, 16>}, {pipeline_mode = #tpu.pipeline_mode<synchronous>, transform_indices = @transform_11, window_bounds = array<i64: 16, 4>}, {pipeline_mode = #tpu.pipeline_mode<synchronous>, transform_indices = @transform_12, window_bounds = array<i64: 1, 4>}, {pipeline_mode = #tpu.pipeline_mode<synchronous>, transform_indices = @transform_13, window_bounds = array<i64: 3, 4, 4>}, {pipeline_mode = #tpu.pipeline_mode<synchronous>, transform_indices = @transform_14, window_bounds = array<i64: 1, 4>}, {pipeline_mode = #tpu.pipeline_mode<synchronous>, transform_indices = @transform_15, window_bounds = array<i64: 4, 16>}, {pipeline_mode = #tpu.pipeline_mode<synchronous>, transform_indices = @transform_16, window_bounds = array<i64: 1, 16>}, {pipeline_mode = #tpu.pipeline_mode<synchronous>, transform_indices = @transform_17, window_bounds = array<i64: 16, 8>}, {pipeline_mode = #tpu.pipeline_mode<synchronous>, transform_indices = @transform_18, window_bounds = array<i64: 1, 8>}, {pipeline_mode = #tpu.pipeline_mode<synchronous>, transform_indices = @transform_19, window_bounds = array<i64: 3, 8, 8>}, {pipeline_mode = #tpu.pipeline_mode<synchronous>, transform_indices = @transform_20, window_bounds = array<i64: 1, 8>}, {pipeline_mode = #tpu.pipeline_mode<synchronous>, transform_indices = @transform_21, window_bounds = array<i64: 8, 32>}, {pipeline_mode = #tpu.pipeline_mode<synchronous>, transform_indices = @transform_22, window_bounds = array<i64: 1, 32>}, {pipeline_mode = #tpu.pipeline_mode<synchronous>, transform_indices = @transform_23, window_bounds = array<i64: 16, 32>}, {pipeline_mode = #tpu.pipeline_mode<synchronous>, transform_indices = @transform_24, window_bounds = array<i64: 1, 32>}, {pipeline_mode = #tpu.pipeline_mode<synchronous>, transform_indices = @transform_25, window_bounds = array<i64: 32, 16>}, {pipeline_mode = #tpu.pipeline_mode<synchronous>, transform_indices = @transform_26, window_bounds = array<i64: 1, 16>}, {pipeline_mode = #tpu.pipeline_mode<synchronous>, transform_indices = @transform_27, window_bounds = array<i64: 3, 16, 16>}, {pipeline_mode = #tpu.pipeline_mode<synchronous>, transform_indices = @transform_28, window_bounds = array<i64: 1, 16>}, {pipeline_mode = #tpu.pipeline_mode<synchronous>, transform_indices = @transform_29, window_bounds = array<i64: 16, 64>}, {pipeline_mode = #tpu.pipeline_mode<synchronous>, transform_indices = @transform_30, window_bounds = array<i64: 1, 64>}, {pipeline_mode = #tpu.pipeline_mode<synchronous>, transform_indices = @transform_31, window_bounds = array<i64: 32, 64>}, {pipeline_mode = #tpu.pipeline_mode<synchronous>, transform_indices = @transform_32, window_bounds = array<i64: 1, 64>}, {pipeline_mode = #tpu.pipeline_mode<synchronous>, transform_indices = @transform_33, window_bounds = array<i64: 64, 32>}, {pipeline_mode = #tpu.pipeline_mode<synchronous>, transform_indices = @transform_34, window_bounds = array<i64: 1, 32>}, {pipeline_mode = #tpu.pipeline_mode<synchronous>, transform_indices = @transform_35, window_bounds = array<i64: 3, 32, 32>}, {pipeline_mode = #tpu.pipeline_mode<synchronous>, transform_indices = @transform_36, window_bounds = array<i64: 1, 32>}, {pipeline_mode = #tpu.pipeline_mode<synchronous>, transform_indices = @transform_37, window_bounds = array<i64: 32, 128>}, {pipeline_mode = #tpu.pipeline_mode<synchronous>, transform_indices = @transform_38, window_bounds = array<i64: 1, 128>}, {pipeline_mode = #tpu.pipeline_mode<synchronous>, transform_indices = @transform_39, window_bounds = array<i64: 64, 128>}, {pipeline_mode = #tpu.pipeline_mode<synchronous>, transform_indices = @transform_40, window_bounds = array<i64: 1, 128>}, {transform_indices = @transform_41, window_bounds = array<i64: 1, 1, 128>}]} {
    %c0 = arith.constant 0 : index
    %c0_0 = arith.constant 0 : index
    %c0_1 = arith.constant 0 : index
    %0 = vector.load %arg1[%c0, %c0_0, %c0_1] : memref<1x32x84xf32, #tpu.memory_space<vmem>>, vector<1x32x84xf32>
    %1 = vector.shape_cast %0 : vector<1x32x84xf32> to vector<32x84xf32>
    %c0_2 = arith.constant 0 : index
    %c0_3 = arith.constant 0 : index
    %2 = vector.load %arg2[%c0_2, %c0_3] : memref<84x4xbf16, #tpu.memory_space<vmem>>, vector<84x4xbf16>
    %3 = arith.truncf %1 : vector<32x84xf32> to vector<32x84xbf16>
    %cst = arith.constant dense<0.000000e+00> : vector<32x4xf32>
    %4 = tpu.matmul %3, %2, %cst {dimension_numbers = #tpu.dot_dimension_numbers<[1], [0], [0], [1], [0, 0, 1, 1], [], []>} : vector<32x84xbf16>, vector<84x4xbf16>, vector<32x4xf32> -> vector<32x4xf32>
    %c0_4 = arith.constant 0 : index
    %c0_5 = arith.constant 0 : index
    %5 = vector.load %arg3[%c0_4, %c0_5] : memref<1x4xf32, #tpu.memory_space<vmem>>, vector<1x4xf32>
    %6 = vector.broadcast %5 : vector<1x4xf32> to vector<32x4xf32>
    %7 = arith.addf %4, %6 : vector<32x4xf32>
    %cst_6 = arith.constant 0.000000e+00 : f32
    %8 = vector.broadcast %cst_6 : f32 to vector<32x4xf32>
    %9 = arith.maximumf %7, %8 : vector<32x4xf32>
    %10 = tpu.iota {dimensions = array<i32: 0>} : vector<32x4xi32>
    %c1_i32 = arith.constant 1 : i32
    %11 = tpu.dynamic_rotate %9 by %c1_i32 dim 0 : vector<32x4xf32>, i32 -> vector<32x4xf32>
    %c1_i32_7 = arith.constant 1 : i32
    %12 = vector.broadcast %c1_i32_7 : i32 to vector<32x4xi32>
    %13 = arith.cmpi slt, %10, %12 : vector<32x4xi32>
    %cst_8 = arith.constant 0xFF800000 : f32
    %14 = vector.broadcast %cst_8 : f32 to vector<32x4xf32>
    %15 = arith.select %13, %14, %11 : vector<32x4xi1>, vector<32x4xf32>
    %16 = arith.maximumf %9, %15 : vector<32x4xf32>
    %17 = tpu.iota {dimensions = array<i32: 0>} : vector<32x4xi32>
    %c31_i32 = arith.constant 31 : i32
    %18 = tpu.dynamic_rotate %9 by %c31_i32 dim 0 : vector<32x4xf32>, i32 -> vector<32x4xf32>
    %c31_i32_9 = arith.constant 31 : i32
    %19 = vector.broadcast %c31_i32_9 : i32 to vector<32x4xi32>
    %20 = arith.cmpi sge, %17, %19 : vector<32x4xi32>
    %cst_10 = arith.constant 0xFF800000 : f32
    %21 = vector.broadcast %cst_10 : f32 to vector<32x4xf32>
    %22 = arith.select %20, %21, %18 : vector<32x4xi1>, vector<32x4xf32>
    %23 = arith.maximumf %16, %22 : vector<32x4xf32>
    %24 = arith.truncf %23 : vector<32x4xf32> to vector<32x4xbf16>
    %25 = tpu.iota {dimensions = array<i32: 0>} : vector<16x32xi32>
    %26 = tpu.iota {dimensions = array<i32: 1>} : vector<16x32xi32>
    %c2_i32 = arith.constant 2 : i32
    %27 = vector.broadcast %c2_i32 : i32 to vector<16x32xi32>
    %28 = arith.muli %27, %25 : vector<16x32xi32>
    %c0_i32 = arith.constant 0 : i32
    %29 = vector.broadcast %c0_i32 : i32 to vector<16x32xi32>
    %30 = arith.addi %28, %29 : vector<16x32xi32>
    %31 = arith.cmpi eq, %26, %30 : vector<16x32xi32>
    %cst_11 = arith.constant 1.000000e+00 : f32
    %cst_12 = arith.constant 0.000000e+00 : f32
    %32 = vector.broadcast %cst_11 : f32 to vector<16x32xf32>
    %33 = vector.broadcast %cst_12 : f32 to vector<16x32xf32>
    %34 = arith.select %31, %32, %33 : vector<16x32xi1>, vector<16x32xf32>
    %35 = arith.truncf %34 : vector<16x32xf32> to vector<16x32xbf16>
    %cst_13 = arith.constant dense<0.000000e+00> : vector<16x4xf32>
    %36 = tpu.matmul %35, %24, %cst_13 {dimension_numbers = #tpu.dot_dimension_numbers<[1], [0], [0], [1], [0, 0, 1, 1], [], []>} : vector<16x32xbf16>, vector<32x4xbf16>, vector<16x4xf32> -> vector<16x4xf32>
    %37 = arith.truncf %36 : vector<16x4xf32> to vector<16x4xbf16>
    %c0_14 = arith.constant 0 : index
    %c0_15 = arith.constant 0 : index
    %38 = vector.load %arg4[%c0_14, %c0_15] : memref<4x4xbf16, #tpu.memory_space<vmem>>, vector<4x4xbf16>
    %cst_16 = arith.constant dense<0.000000e+00> : vector<16x4xf32>
    %39 = tpu.matmul %37, %38, %cst_16 {dimension_numbers = #tpu.dot_dimension_numbers<[1], [0], [0], [1], [0, 0, 1, 1], [], []>} : vector<16x4xbf16>, vector<4x4xbf16>, vector<16x4xf32> -> vector<16x4xf32>
    %c0_17 = arith.constant 0 : index
    %c0_18 = arith.constant 0 : index
    %40 = vector.load %arg5[%c0_17, %c0_18] : memref<1x4xf32, #tpu.memory_space<vmem>>, vector<1x4xf32>
    %41 = vector.broadcast %40 : vector<1x4xf32> to vector<16x4xf32>
    %42 = arith.addf %39, %41 : vector<16x4xf32>
    %cst_19 = arith.constant 0.000000e+00 : f32
    %43 = vector.broadcast %cst_19 : f32 to vector<16x4xf32>
    %44 = arith.maximumf %42, %43 : vector<16x4xf32>
    %c1 = arith.constant 1 : index
    %c0_20 = arith.constant 0 : index
    %c0_21 = arith.constant 0 : index
    %45 = vector.load %arg6[%c1, %c0_20, %c0_21] : memref<3x4x4xbf16, #tpu.memory_space<vmem>>, vector<1x4x4xbf16>
    %46 = vector.shape_cast %45 : vector<1x4x4xbf16> to vector<4x4xbf16>
    %47 = arith.truncf %44 : vector<16x4xf32> to vector<16x4xbf16>
    %cst_22 = arith.constant dense<0.000000e+00> : vector<16x4xf32>
    %48 = tpu.matmul %47, %46, %cst_22 {dimension_numbers = #tpu.dot_dimension_numbers<[1], [0], [0], [1], [0, 0, 1, 1], [], []>} : vector<16x4xbf16>, vector<4x4xbf16>, vector<16x4xf32> -> vector<16x4xf32>
    %49 = tpu.iota {dimensions = array<i32: 0>} : vector<16x4xi32>
    %c1_i32_23 = arith.constant 1 : i32
    %50 = tpu.dynamic_rotate %44 by %c1_i32_23 dim 0 : vector<16x4xf32>, i32 -> vector<16x4xf32>
    %c1_i32_24 = arith.constant 1 : i32
    %51 = vector.broadcast %c1_i32_24 : i32 to vector<16x4xi32>
    %52 = arith.cmpi slt, %49, %51 : vector<16x4xi32>
    %cst_25 = arith.constant 0.000000e+00 : f32
    %53 = vector.broadcast %cst_25 : f32 to vector<16x4xf32>
    %54 = arith.select %52, %53, %50 : vector<16x4xi1>, vector<16x4xf32>
    %c0_26 = arith.constant 0 : index
    %c0_27 = arith.constant 0 : index
    %c0_28 = arith.constant 0 : index
    %55 = vector.load %arg6[%c0_26, %c0_27, %c0_28] : memref<3x4x4xbf16, #tpu.memory_space<vmem>>, vector<1x4x4xbf16>
    %56 = vector.shape_cast %55 : vector<1x4x4xbf16> to vector<4x4xbf16>
    %57 = arith.truncf %54 : vector<16x4xf32> to vector<16x4xbf16>
    %cst_29 = arith.constant dense<0.000000e+00> : vector<16x4xf32>
    %58 = tpu.matmul %57, %56, %cst_29 {dimension_numbers = #tpu.dot_dimension_numbers<[1], [0], [0], [1], [0, 0, 1, 1], [], []>} : vector<16x4xbf16>, vector<4x4xbf16>, vector<16x4xf32> -> vector<16x4xf32>
    %59 = arith.addf %48, %58 : vector<16x4xf32>
    %60 = tpu.iota {dimensions = array<i32: 0>} : vector<16x4xi32>
    %c15_i32 = arith.constant 15 : i32
    %61 = tpu.dynamic_rotate %44 by %c15_i32 dim 0 : vector<16x4xf32>, i32 -> vector<16x4xf32>
    %c15_i32_30 = arith.constant 15 : i32
    %62 = vector.broadcast %c15_i32_30 : i32 to vector<16x4xi32>
    %63 = arith.cmpi sge, %60, %62 : vector<16x4xi32>
    %cst_31 = arith.constant 0.000000e+00 : f32
    %64 = vector.broadcast %cst_31 : f32 to vector<16x4xf32>
    %65 = arith.select %63, %64, %61 : vector<16x4xi1>, vector<16x4xf32>
    %c2 = arith.constant 2 : index
    %c0_32 = arith.constant 0 : index
    %c0_33 = arith.constant 0 : index
    %66 = vector.load %arg6[%c2, %c0_32, %c0_33] : memref<3x4x4xbf16, #tpu.memory_space<vmem>>, vector<1x4x4xbf16>
    %67 = vector.shape_cast %66 : vector<1x4x4xbf16> to vector<4x4xbf16>
    %68 = arith.truncf %65 : vector<16x4xf32> to vector<16x4xbf16>
    %cst_34 = arith.constant dense<0.000000e+00> : vector<16x4xf32>
    %69 = tpu.matmul %68, %67, %cst_34 {dimension_numbers = #tpu.dot_dimension_numbers<[1], [0], [0], [1], [0, 0, 1, 1], [], []>} : vector<16x4xbf16>, vector<4x4xbf16>, vector<16x4xf32> -> vector<16x4xf32>
    %70 = arith.addf %59, %69 : vector<16x4xf32>
    %c0_35 = arith.constant 0 : index
    %c0_36 = arith.constant 0 : index
    %71 = vector.load %arg10[%c0_35, %c0_36] : memref<4x16xbf16, #tpu.memory_space<vmem>>, vector<4x16xbf16>
    %cst_37 = arith.constant dense<0.000000e+00> : vector<16x16xf32>
    %72 = tpu.matmul %37, %71, %cst_37 {dimension_numbers = #tpu.dot_dimension_numbers<[1], [0], [0], [1], [0, 0, 1, 1], [], []>} : vector<16x4xbf16>, vector<4x16xbf16>, vector<16x16xf32> -> vector<16x16xf32>
    %c0_38 = arith.constant 0 : index
    %c0_39 = arith.constant 0 : index
    %73 = vector.load %arg11[%c0_38, %c0_39] : memref<1x16xf32, #tpu.memory_space<vmem>>, vector<1x16xf32>
    %74 = vector.broadcast %73 : vector<1x16xf32> to vector<16x16xf32>
    %75 = arith.addf %72, %74 : vector<16x16xf32>
    %c0_40 = arith.constant 0 : index
    %c0_41 = arith.constant 0 : index
    %76 = vector.load %arg7[%c0_40, %c0_41] : memref<1x4xf32, #tpu.memory_space<vmem>>, vector<1x4xf32>
    %77 = vector.broadcast %76 : vector<1x4xf32> to vector<16x4xf32>
    %78 = arith.addf %70, %77 : vector<16x4xf32>
    %cst_42 = arith.constant 0.000000e+00 : f32
    %79 = vector.broadcast %cst_42 : f32 to vector<16x4xf32>
    %80 = arith.maximumf %78, %79 : vector<16x4xf32>
    %c0_43 = arith.constant 0 : index
    %c0_44 = arith.constant 0 : index
    %81 = vector.load %arg8[%c0_43, %c0_44] : memref<4x16xbf16, #tpu.memory_space<vmem>>, vector<4x16xbf16>
    %82 = arith.truncf %80 : vector<16x4xf32> to vector<16x4xbf16>
    %cst_45 = arith.constant dense<0.000000e+00> : vector<16x16xf32>
    %83 = tpu.matmul %82, %81, %cst_45 {dimension_numbers = #tpu.dot_dimension_numbers<[1], [0], [0], [1], [0, 0, 1, 1], [], []>} : vector<16x4xbf16>, vector<4x16xbf16>, vector<16x16xf32> -> vector<16x16xf32>
    %c0_46 = arith.constant 0 : index
    %c0_47 = arith.constant 0 : index
    %84 = vector.load %arg9[%c0_46, %c0_47] : memref<1x16xf32, #tpu.memory_space<vmem>>, vector<1x16xf32>
    %85 = vector.broadcast %84 : vector<1x16xf32> to vector<16x16xf32>
    %86 = arith.addf %83, %85 : vector<16x16xf32>
    %87 = arith.addf %86, %75 : vector<16x16xf32>
    %cst_48 = arith.constant 0.000000e+00 : f32
    %88 = vector.broadcast %cst_48 : f32 to vector<16x16xf32>
    %89 = arith.maximumf %87, %88 : vector<16x16xf32>
    %90 = arith.truncf %89 : vector<16x16xf32> to vector<16x16xbf16>
    %c0_49 = arith.constant 0 : index
    %c0_50 = arith.constant 0 : index
    %91 = vector.load %arg12[%c0_49, %c0_50] : memref<16x4xbf16, #tpu.memory_space<vmem>>, vector<16x4xbf16>
    %cst_51 = arith.constant dense<0.000000e+00> : vector<16x4xf32>
    %92 = tpu.matmul %90, %91, %cst_51 {dimension_numbers = #tpu.dot_dimension_numbers<[1], [0], [0], [1], [0, 0, 1, 1], [], []>} : vector<16x16xbf16>, vector<16x4xbf16>, vector<16x4xf32> -> vector<16x4xf32>
    %c0_52 = arith.constant 0 : index
    %c0_53 = arith.constant 0 : index
    %93 = vector.load %arg13[%c0_52, %c0_53] : memref<1x4xf32, #tpu.memory_space<vmem>>, vector<1x4xf32>
    %94 = vector.broadcast %93 : vector<1x4xf32> to vector<16x4xf32>
    %95 = arith.addf %92, %94 : vector<16x4xf32>
    %cst_54 = arith.constant 0.000000e+00 : f32
    %96 = vector.broadcast %cst_54 : f32 to vector<16x4xf32>
    %97 = arith.maximumf %95, %96 : vector<16x4xf32>
    %c1_55 = arith.constant 1 : index
    %c0_56 = arith.constant 0 : index
    %c0_57 = arith.constant 0 : index
    %98 = vector.load %arg14[%c1_55, %c0_56, %c0_57] : memref<3x4x4xbf16, #tpu.memory_space<vmem>>, vector<1x4x4xbf16>
    %99 = vector.shape_cast %98 : vector<1x4x4xbf16> to vector<4x4xbf16>
    %100 = arith.truncf %97 : vector<16x4xf32> to vector<16x4xbf16>
    %cst_58 = arith.constant dense<0.000000e+00> : vector<16x4xf32>
    %101 = tpu.matmul %100, %99, %cst_58 {dimension_numbers = #tpu.dot_dimension_numbers<[1], [0], [0], [1], [0, 0, 1, 1], [], []>} : vector<16x4xbf16>, vector<4x4xbf16>, vector<16x4xf32> -> vector<16x4xf32>
    %102 = tpu.iota {dimensions = array<i32: 0>} : vector<16x4xi32>
    %c1_i32_59 = arith.constant 1 : i32
    %103 = tpu.dynamic_rotate %97 by %c1_i32_59 dim 0 : vector<16x4xf32>, i32 -> vector<16x4xf32>
    %c1_i32_60 = arith.constant 1 : i32
    %104 = vector.broadcast %c1_i32_60 : i32 to vector<16x4xi32>
    %105 = arith.cmpi slt, %102, %104 : vector<16x4xi32>
    %cst_61 = arith.constant 0.000000e+00 : f32
    %106 = vector.broadcast %cst_61 : f32 to vector<16x4xf32>
    %107 = arith.select %105, %106, %103 : vector<16x4xi1>, vector<16x4xf32>
    %c0_62 = arith.constant 0 : index
    %c0_63 = arith.constant 0 : index
    %c0_64 = arith.constant 0 : index
    %108 = vector.load %arg14[%c0_62, %c0_63, %c0_64] : memref<3x4x4xbf16, #tpu.memory_space<vmem>>, vector<1x4x4xbf16>
    %109 = vector.shape_cast %108 : vector<1x4x4xbf16> to vector<4x4xbf16>
    %110 = arith.truncf %107 : vector<16x4xf32> to vector<16x4xbf16>
    %cst_65 = arith.constant dense<0.000000e+00> : vector<16x4xf32>
    %111 = tpu.matmul %110, %109, %cst_65 {dimension_numbers = #tpu.dot_dimension_numbers<[1], [0], [0], [1], [0, 0, 1, 1], [], []>} : vector<16x4xbf16>, vector<4x4xbf16>, vector<16x4xf32> -> vector<16x4xf32>
    %112 = arith.addf %101, %111 : vector<16x4xf32>
    %113 = tpu.iota {dimensions = array<i32: 0>} : vector<16x4xi32>
    %c15_i32_66 = arith.constant 15 : i32
    %114 = tpu.dynamic_rotate %97 by %c15_i32_66 dim 0 : vector<16x4xf32>, i32 -> vector<16x4xf32>
    %c15_i32_67 = arith.constant 15 : i32
    %115 = vector.broadcast %c15_i32_67 : i32 to vector<16x4xi32>
    %116 = arith.cmpi sge, %113, %115 : vector<16x4xi32>
    %cst_68 = arith.constant 0.000000e+00 : f32
    %117 = vector.broadcast %cst_68 : f32 to vector<16x4xf32>
    %118 = arith.select %116, %117, %114 : vector<16x4xi1>, vector<16x4xf32>
    %c2_69 = arith.constant 2 : index
    %c0_70 = arith.constant 0 : index
    %c0_71 = arith.constant 0 : index
    %119 = vector.load %arg14[%c2_69, %c0_70, %c0_71] : memref<3x4x4xbf16, #tpu.memory_space<vmem>>, vector<1x4x4xbf16>
    %120 = vector.shape_cast %119 : vector<1x4x4xbf16> to vector<4x4xbf16>
    %121 = arith.truncf %118 : vector<16x4xf32> to vector<16x4xbf16>
    %cst_72 = arith.constant dense<0.000000e+00> : vector<16x4xf32>
    %122 = tpu.matmul %121, %120, %cst_72 {dimension_numbers = #tpu.dot_dimension_numbers<[1], [0], [0], [1], [0, 0, 1, 1], [], []>} : vector<16x4xbf16>, vector<4x4xbf16>, vector<16x4xf32> -> vector<16x4xf32>
    %123 = arith.addf %112, %122 : vector<16x4xf32>
    %c0_73 = arith.constant 0 : index
    %c0_74 = arith.constant 0 : index
    %124 = vector.load %arg15[%c0_73, %c0_74] : memref<1x4xf32, #tpu.memory_space<vmem>>, vector<1x4xf32>
    %125 = vector.broadcast %124 : vector<1x4xf32> to vector<16x4xf32>
    %126 = arith.addf %123, %125 : vector<16x4xf32>
    %cst_75 = arith.constant 0.000000e+00 : f32
    %127 = vector.broadcast %cst_75 : f32 to vector<16x4xf32>
    %128 = arith.maximumf %126, %127 : vector<16x4xf32>
    %c0_76 = arith.constant 0 : index
    %c0_77 = arith.constant 0 : index
    %129 = vector.load %arg16[%c0_76, %c0_77] : memref<4x16xbf16, #tpu.memory_space<vmem>>, vector<4x16xbf16>
    %130 = arith.truncf %128 : vector<16x4xf32> to vector<16x4xbf16>
    %cst_78 = arith.constant dense<0.000000e+00> : vector<16x16xf32>
    %131 = tpu.matmul %130, %129, %cst_78 {dimension_numbers = #tpu.dot_dimension_numbers<[1], [0], [0], [1], [0, 0, 1, 1], [], []>} : vector<16x4xbf16>, vector<4x16xbf16>, vector<16x16xf32> -> vector<16x16xf32>
    %c0_79 = arith.constant 0 : index
    %c0_80 = arith.constant 0 : index
    %132 = vector.load %arg17[%c0_79, %c0_80] : memref<1x16xf32, #tpu.memory_space<vmem>>, vector<1x16xf32>
    %133 = vector.broadcast %132 : vector<1x16xf32> to vector<16x16xf32>
    %134 = arith.addf %131, %133 : vector<16x16xf32>
    %135 = arith.addf %134, %89 : vector<16x16xf32>
    %cst_81 = arith.constant 0.000000e+00 : f32
    %136 = vector.broadcast %cst_81 : f32 to vector<16x16xf32>
    %137 = arith.maximumf %135, %136 : vector<16x16xf32>
    %138 = arith.truncf %137 : vector<16x16xf32> to vector<16x16xbf16>
    %c0_82 = arith.constant 0 : index
    %c0_83 = arith.constant 0 : index
    %139 = vector.load %arg18[%c0_82, %c0_83] : memref<16x8xbf16, #tpu.memory_space<vmem>>, vector<16x8xbf16>
    %cst_84 = arith.constant dense<0.000000e+00> : vector<16x8xf32>
    %140 = tpu.matmul %138, %139, %cst_84 {dimension_numbers = #tpu.dot_dimension_numbers<[1], [0], [0], [1], [0, 0, 1, 1], [], []>} : vector<16x16xbf16>, vector<16x8xbf16>, vector<16x8xf32> -> vector<16x8xf32>
    %c0_85 = arith.constant 0 : index
    %c0_86 = arith.constant 0 : index
    %141 = vector.load %arg19[%c0_85, %c0_86] : memref<1x8xf32, #tpu.memory_space<vmem>>, vector<1x8xf32>
    %142 = vector.broadcast %141 : vector<1x8xf32> to vector<16x8xf32>
    %143 = arith.addf %140, %142 : vector<16x8xf32>
    %cst_87 = arith.constant 0.000000e+00 : f32
    %144 = vector.broadcast %cst_87 : f32 to vector<16x8xf32>
    %145 = arith.maximumf %143, %144 : vector<16x8xf32>
    %146 = arith.truncf %145 : vector<16x8xf32> to vector<16x8xbf16>
    %147 = tpu.iota {dimensions = array<i32: 0>} : vector<8x16xi32>
    %148 = tpu.iota {dimensions = array<i32: 1>} : vector<8x16xi32>
    %c2_i32_88 = arith.constant 2 : i32
    %149 = vector.broadcast %c2_i32_88 : i32 to vector<8x16xi32>
    %150 = arith.muli %149, %147 : vector<8x16xi32>
    %c-1_i32 = arith.constant -1 : i32
    %151 = vector.broadcast %c-1_i32 : i32 to vector<8x16xi32>
    %152 = arith.addi %150, %151 : vector<8x16xi32>
    %153 = arith.cmpi eq, %148, %152 : vector<8x16xi32>
    %cst_89 = arith.constant 1.000000e+00 : f32
    %cst_90 = arith.constant 0.000000e+00 : f32
    %154 = vector.broadcast %cst_89 : f32 to vector<8x16xf32>
    %155 = vector.broadcast %cst_90 : f32 to vector<8x16xf32>
    %156 = arith.select %153, %154, %155 : vector<8x16xi1>, vector<8x16xf32>
    %157 = arith.truncf %156 : vector<8x16xf32> to vector<8x16xbf16>
    %cst_91 = arith.constant dense<0.000000e+00> : vector<8x8xf32>
    %158 = tpu.matmul %157, %146, %cst_91 {dimension_numbers = #tpu.dot_dimension_numbers<[1], [0], [0], [1], [0, 0, 1, 1], [], []>} : vector<8x16xbf16>, vector<16x8xbf16>, vector<8x8xf32> -> vector<8x8xf32>
    %c0_92 = arith.constant 0 : index
    %c0_93 = arith.constant 0 : index
    %c0_94 = arith.constant 0 : index
    %159 = vector.load %arg20[%c0_92, %c0_93, %c0_94] : memref<3x8x8xbf16, #tpu.memory_space<vmem>>, vector<1x8x8xbf16>
    %160 = vector.shape_cast %159 : vector<1x8x8xbf16> to vector<8x8xbf16>
    %161 = arith.truncf %158 : vector<8x8xf32> to vector<8x8xbf16>
    %cst_95 = arith.constant dense<0.000000e+00> : vector<8x8xf32>
    %162 = tpu.matmul %161, %160, %cst_95 {dimension_numbers = #tpu.dot_dimension_numbers<[1], [0], [0], [1], [0, 0, 1, 1], [], []>} : vector<8x8xbf16>, vector<8x8xbf16>, vector<8x8xf32> -> vector<8x8xf32>
    %163 = tpu.iota {dimensions = array<i32: 0>} : vector<8x16xi32>
    %164 = tpu.iota {dimensions = array<i32: 1>} : vector<8x16xi32>
    %c2_i32_96 = arith.constant 2 : i32
    %165 = vector.broadcast %c2_i32_96 : i32 to vector<8x16xi32>
    %166 = arith.muli %165, %163 : vector<8x16xi32>
    %c0_i32_97 = arith.constant 0 : i32
    %167 = vector.broadcast %c0_i32_97 : i32 to vector<8x16xi32>
    %168 = arith.addi %166, %167 : vector<8x16xi32>
    %169 = arith.cmpi eq, %164, %168 : vector<8x16xi32>
    %cst_98 = arith.constant 1.000000e+00 : f32
    %cst_99 = arith.constant 0.000000e+00 : f32
    %170 = vector.broadcast %cst_98 : f32 to vector<8x16xf32>
    %171 = vector.broadcast %cst_99 : f32 to vector<8x16xf32>
    %172 = arith.select %169, %170, %171 : vector<8x16xi1>, vector<8x16xf32>
    %173 = arith.truncf %172 : vector<8x16xf32> to vector<8x16xbf16>
    %cst_100 = arith.constant dense<0.000000e+00> : vector<8x8xf32>
    %174 = tpu.matmul %173, %146, %cst_100 {dimension_numbers = #tpu.dot_dimension_numbers<[1], [0], [0], [1], [0, 0, 1, 1], [], []>} : vector<8x16xbf16>, vector<16x8xbf16>, vector<8x8xf32> -> vector<8x8xf32>
    %c1_101 = arith.constant 1 : index
    %c0_102 = arith.constant 0 : index
    %c0_103 = arith.constant 0 : index
    %175 = vector.load %arg20[%c1_101, %c0_102, %c0_103] : memref<3x8x8xbf16, #tpu.memory_space<vmem>>, vector<1x8x8xbf16>
    %176 = vector.shape_cast %175 : vector<1x8x8xbf16> to vector<8x8xbf16>
    %177 = arith.truncf %174 : vector<8x8xf32> to vector<8x8xbf16>
    %cst_104 = arith.constant dense<0.000000e+00> : vector<8x8xf32>
    %178 = tpu.matmul %177, %176, %cst_104 {dimension_numbers = #tpu.dot_dimension_numbers<[1], [0], [0], [1], [0, 0, 1, 1], [], []>} : vector<8x8xbf16>, vector<8x8xbf16>, vector<8x8xf32> -> vector<8x8xf32>
    %179 = arith.addf %162, %178 : vector<8x8xf32>
    %180 = tpu.iota {dimensions = array<i32: 0>} : vector<8x16xi32>
    %181 = tpu.iota {dimensions = array<i32: 1>} : vector<8x16xi32>
    %c2_i32_105 = arith.constant 2 : i32
    %182 = vector.broadcast %c2_i32_105 : i32 to vector<8x16xi32>
    %183 = arith.muli %182, %180 : vector<8x16xi32>
    %c1_i32_106 = arith.constant 1 : i32
    %184 = vector.broadcast %c1_i32_106 : i32 to vector<8x16xi32>
    %185 = arith.addi %183, %184 : vector<8x16xi32>
    %186 = arith.cmpi eq, %181, %185 : vector<8x16xi32>
    %cst_107 = arith.constant 1.000000e+00 : f32
    %cst_108 = arith.constant 0.000000e+00 : f32
    %187 = vector.broadcast %cst_107 : f32 to vector<8x16xf32>
    %188 = vector.broadcast %cst_108 : f32 to vector<8x16xf32>
    %189 = arith.select %186, %187, %188 : vector<8x16xi1>, vector<8x16xf32>
    %190 = arith.truncf %189 : vector<8x16xf32> to vector<8x16xbf16>
    %cst_109 = arith.constant dense<0.000000e+00> : vector<8x8xf32>
    %191 = tpu.matmul %190, %146, %cst_109 {dimension_numbers = #tpu.dot_dimension_numbers<[1], [0], [0], [1], [0, 0, 1, 1], [], []>} : vector<8x16xbf16>, vector<16x8xbf16>, vector<8x8xf32> -> vector<8x8xf32>
    %c2_110 = arith.constant 2 : index
    %c0_111 = arith.constant 0 : index
    %c0_112 = arith.constant 0 : index
    %192 = vector.load %arg20[%c2_110, %c0_111, %c0_112] : memref<3x8x8xbf16, #tpu.memory_space<vmem>>, vector<1x8x8xbf16>
    %193 = vector.shape_cast %192 : vector<1x8x8xbf16> to vector<8x8xbf16>
    %194 = arith.truncf %191 : vector<8x8xf32> to vector<8x8xbf16>
    %cst_113 = arith.constant dense<0.000000e+00> : vector<8x8xf32>
    %195 = tpu.matmul %194, %193, %cst_113 {dimension_numbers = #tpu.dot_dimension_numbers<[1], [0], [0], [1], [0, 0, 1, 1], [], []>} : vector<8x8xbf16>, vector<8x8xbf16>, vector<8x8xf32> -> vector<8x8xf32>
    %196 = arith.addf %179, %195 : vector<8x8xf32>
    %197 = tpu.iota {dimensions = array<i32: 0>} : vector<8x16xi32>
    %198 = tpu.iota {dimensions = array<i32: 1>} : vector<8x16xi32>
    %c2_i32_114 = arith.constant 2 : i32
    %199 = vector.broadcast %c2_i32_114 : i32 to vector<8x16xi32>
    %200 = arith.muli %199, %197 : vector<8x16xi32>
    %c0_i32_115 = arith.constant 0 : i32
    %201 = vector.broadcast %c0_i32_115 : i32 to vector<8x16xi32>
    %202 = arith.addi %200, %201 : vector<8x16xi32>
    %203 = arith.cmpi eq, %198, %202 : vector<8x16xi32>
    %cst_116 = arith.constant 1.000000e+00 : f32
    %cst_117 = arith.constant 0.000000e+00 : f32
    %204 = vector.broadcast %cst_116 : f32 to vector<8x16xf32>
    %205 = vector.broadcast %cst_117 : f32 to vector<8x16xf32>
    %206 = arith.select %203, %204, %205 : vector<8x16xi1>, vector<8x16xf32>
    %207 = arith.truncf %206 : vector<8x16xf32> to vector<8x16xbf16>
    %cst_118 = arith.constant dense<0.000000e+00> : vector<8x16xf32>
    %208 = tpu.matmul %207, %138, %cst_118 {dimension_numbers = #tpu.dot_dimension_numbers<[1], [0], [0], [1], [0, 0, 1, 1], [], []>} : vector<8x16xbf16>, vector<16x16xbf16>, vector<8x16xf32> -> vector<8x16xf32>
    %c0_119 = arith.constant 0 : index
    %c0_120 = arith.constant 0 : index
    %209 = vector.load %arg24[%c0_119, %c0_120] : memref<16x32xbf16, #tpu.memory_space<vmem>>, vector<16x32xbf16>
    %210 = arith.truncf %208 : vector<8x16xf32> to vector<8x16xbf16>
    %cst_121 = arith.constant dense<0.000000e+00> : vector<8x32xf32>
    %211 = tpu.matmul %210, %209, %cst_121 {dimension_numbers = #tpu.dot_dimension_numbers<[1], [0], [0], [1], [0, 0, 1, 1], [], []>} : vector<8x16xbf16>, vector<16x32xbf16>, vector<8x32xf32> -> vector<8x32xf32>
    %c0_122 = arith.constant 0 : index
    %c0_123 = arith.constant 0 : index
    %212 = vector.load %arg25[%c0_122, %c0_123] : memref<1x32xf32, #tpu.memory_space<vmem>>, vector<1x32xf32>
    %213 = vector.broadcast %212 : vector<1x32xf32> to vector<8x32xf32>
    %214 = arith.addf %211, %213 : vector<8x32xf32>
    %c0_124 = arith.constant 0 : index
    %c0_125 = arith.constant 0 : index
    %215 = vector.load %arg21[%c0_124, %c0_125] : memref<1x8xf32, #tpu.memory_space<vmem>>, vector<1x8xf32>
    %216 = vector.broadcast %215 : vector<1x8xf32> to vector<8x8xf32>
    %217 = arith.addf %196, %216 : vector<8x8xf32>
    %cst_126 = arith.constant 0.000000e+00 : f32
    %218 = vector.broadcast %cst_126 : f32 to vector<8x8xf32>
    %219 = arith.maximumf %217, %218 : vector<8x8xf32>
    %c0_127 = arith.constant 0 : index
    %c0_128 = arith.constant 0 : index
    %220 = vector.load %arg22[%c0_127, %c0_128] : memref<8x32xbf16, #tpu.memory_space<vmem>>, vector<8x32xbf16>
    %221 = arith.truncf %219 : vector<8x8xf32> to vector<8x8xbf16>
    %cst_129 = arith.constant dense<0.000000e+00> : vector<8x32xf32>
    %222 = tpu.matmul %221, %220, %cst_129 {dimension_numbers = #tpu.dot_dimension_numbers<[1], [0], [0], [1], [0, 0, 1, 1], [], []>} : vector<8x8xbf16>, vector<8x32xbf16>, vector<8x32xf32> -> vector<8x32xf32>
    %c0_130 = arith.constant 0 : index
    %c0_131 = arith.constant 0 : index
    %223 = vector.load %arg23[%c0_130, %c0_131] : memref<1x32xf32, #tpu.memory_space<vmem>>, vector<1x32xf32>
    %224 = vector.broadcast %223 : vector<1x32xf32> to vector<8x32xf32>
    %225 = arith.addf %222, %224 : vector<8x32xf32>
    %226 = arith.addf %225, %214 : vector<8x32xf32>
    %cst_132 = arith.constant 0.000000e+00 : f32
    %227 = vector.broadcast %cst_132 : f32 to vector<8x32xf32>
    %228 = arith.maximumf %226, %227 : vector<8x32xf32>
    %229 = arith.truncf %228 : vector<8x32xf32> to vector<8x32xbf16>
    %c0_133 = arith.constant 0 : index
    %c0_134 = arith.constant 0 : index
    %230 = vector.load %arg26[%c0_133, %c0_134] : memref<32x16xbf16, #tpu.memory_space<vmem>>, vector<32x16xbf16>
    %cst_135 = arith.constant dense<0.000000e+00> : vector<8x16xf32>
    %231 = tpu.matmul %229, %230, %cst_135 {dimension_numbers = #tpu.dot_dimension_numbers<[1], [0], [0], [1], [0, 0, 1, 1], [], []>} : vector<8x32xbf16>, vector<32x16xbf16>, vector<8x16xf32> -> vector<8x16xf32>
    %c0_136 = arith.constant 0 : index
    %c0_137 = arith.constant 0 : index
    %232 = vector.load %arg27[%c0_136, %c0_137] : memref<1x16xf32, #tpu.memory_space<vmem>>, vector<1x16xf32>
    %233 = vector.broadcast %232 : vector<1x16xf32> to vector<8x16xf32>
    %234 = arith.addf %231, %233 : vector<8x16xf32>
    %cst_138 = arith.constant 0.000000e+00 : f32
    %235 = vector.broadcast %cst_138 : f32 to vector<8x16xf32>
    %236 = arith.maximumf %234, %235 : vector<8x16xf32>
    %237 = arith.truncf %236 : vector<8x16xf32> to vector<8x16xbf16>
    %238 = tpu.iota {dimensions = array<i32: 0>} : vector<4x8xi32>
    %239 = tpu.iota {dimensions = array<i32: 1>} : vector<4x8xi32>
    %c2_i32_139 = arith.constant 2 : i32
    %240 = vector.broadcast %c2_i32_139 : i32 to vector<4x8xi32>
    %241 = arith.muli %240, %238 : vector<4x8xi32>
    %c-1_i32_140 = arith.constant -1 : i32
    %242 = vector.broadcast %c-1_i32_140 : i32 to vector<4x8xi32>
    %243 = arith.addi %241, %242 : vector<4x8xi32>
    %244 = arith.cmpi eq, %239, %243 : vector<4x8xi32>
    %cst_141 = arith.constant 1.000000e+00 : f32
    %cst_142 = arith.constant 0.000000e+00 : f32
    %245 = vector.broadcast %cst_141 : f32 to vector<4x8xf32>
    %246 = vector.broadcast %cst_142 : f32 to vector<4x8xf32>
    %247 = arith.select %244, %245, %246 : vector<4x8xi1>, vector<4x8xf32>
    %248 = arith.truncf %247 : vector<4x8xf32> to vector<4x8xbf16>
    %cst_143 = arith.constant dense<0.000000e+00> : vector<4x16xf32>
    %249 = tpu.matmul %248, %237, %cst_143 {dimension_numbers = #tpu.dot_dimension_numbers<[1], [0], [0], [1], [0, 0, 1, 1], [], []>} : vector<4x8xbf16>, vector<8x16xbf16>, vector<4x16xf32> -> vector<4x16xf32>
    %c0_144 = arith.constant 0 : index
    %c0_145 = arith.constant 0 : index
    %c0_146 = arith.constant 0 : index
    %250 = vector.load %arg28[%c0_144, %c0_145, %c0_146] : memref<3x16x16xbf16, #tpu.memory_space<vmem>>, vector<1x16x16xbf16>
    %251 = vector.shape_cast %250 : vector<1x16x16xbf16> to vector<16x16xbf16>
    %252 = arith.truncf %249 : vector<4x16xf32> to vector<4x16xbf16>
    %cst_147 = arith.constant dense<0.000000e+00> : vector<4x16xf32>
    %253 = tpu.matmul %252, %251, %cst_147 {dimension_numbers = #tpu.dot_dimension_numbers<[1], [0], [0], [1], [0, 0, 1, 1], [], []>} : vector<4x16xbf16>, vector<16x16xbf16>, vector<4x16xf32> -> vector<4x16xf32>
    %254 = tpu.iota {dimensions = array<i32: 0>} : vector<4x8xi32>
    %255 = tpu.iota {dimensions = array<i32: 1>} : vector<4x8xi32>
    %c2_i32_148 = arith.constant 2 : i32
    %256 = vector.broadcast %c2_i32_148 : i32 to vector<4x8xi32>
    %257 = arith.muli %256, %254 : vector<4x8xi32>
    %c0_i32_149 = arith.constant 0 : i32
    %258 = vector.broadcast %c0_i32_149 : i32 to vector<4x8xi32>
    %259 = arith.addi %257, %258 : vector<4x8xi32>
    %260 = arith.cmpi eq, %255, %259 : vector<4x8xi32>
    %cst_150 = arith.constant 1.000000e+00 : f32
    %cst_151 = arith.constant 0.000000e+00 : f32
    %261 = vector.broadcast %cst_150 : f32 to vector<4x8xf32>
    %262 = vector.broadcast %cst_151 : f32 to vector<4x8xf32>
    %263 = arith.select %260, %261, %262 : vector<4x8xi1>, vector<4x8xf32>
    %264 = arith.truncf %263 : vector<4x8xf32> to vector<4x8xbf16>
    %cst_152 = arith.constant dense<0.000000e+00> : vector<4x16xf32>
    %265 = tpu.matmul %264, %237, %cst_152 {dimension_numbers = #tpu.dot_dimension_numbers<[1], [0], [0], [1], [0, 0, 1, 1], [], []>} : vector<4x8xbf16>, vector<8x16xbf16>, vector<4x16xf32> -> vector<4x16xf32>
    %c1_153 = arith.constant 1 : index
    %c0_154 = arith.constant 0 : index
    %c0_155 = arith.constant 0 : index
    %266 = vector.load %arg28[%c1_153, %c0_154, %c0_155] : memref<3x16x16xbf16, #tpu.memory_space<vmem>>, vector<1x16x16xbf16>
    %267 = vector.shape_cast %266 : vector<1x16x16xbf16> to vector<16x16xbf16>
    %268 = arith.truncf %265 : vector<4x16xf32> to vector<4x16xbf16>
    %cst_156 = arith.constant dense<0.000000e+00> : vector<4x16xf32>
    %269 = tpu.matmul %268, %267, %cst_156 {dimension_numbers = #tpu.dot_dimension_numbers<[1], [0], [0], [1], [0, 0, 1, 1], [], []>} : vector<4x16xbf16>, vector<16x16xbf16>, vector<4x16xf32> -> vector<4x16xf32>
    %270 = arith.addf %253, %269 : vector<4x16xf32>
    %271 = tpu.iota {dimensions = array<i32: 0>} : vector<4x8xi32>
    %272 = tpu.iota {dimensions = array<i32: 1>} : vector<4x8xi32>
    %c2_i32_157 = arith.constant 2 : i32
    %273 = vector.broadcast %c2_i32_157 : i32 to vector<4x8xi32>
    %274 = arith.muli %273, %271 : vector<4x8xi32>
    %c1_i32_158 = arith.constant 1 : i32
    %275 = vector.broadcast %c1_i32_158 : i32 to vector<4x8xi32>
    %276 = arith.addi %274, %275 : vector<4x8xi32>
    %277 = arith.cmpi eq, %272, %276 : vector<4x8xi32>
    %cst_159 = arith.constant 1.000000e+00 : f32
    %cst_160 = arith.constant 0.000000e+00 : f32
    %278 = vector.broadcast %cst_159 : f32 to vector<4x8xf32>
    %279 = vector.broadcast %cst_160 : f32 to vector<4x8xf32>
    %280 = arith.select %277, %278, %279 : vector<4x8xi1>, vector<4x8xf32>
    %281 = arith.truncf %280 : vector<4x8xf32> to vector<4x8xbf16>
    %cst_161 = arith.constant dense<0.000000e+00> : vector<4x16xf32>
    %282 = tpu.matmul %281, %237, %cst_161 {dimension_numbers = #tpu.dot_dimension_numbers<[1], [0], [0], [1], [0, 0, 1, 1], [], []>} : vector<4x8xbf16>, vector<8x16xbf16>, vector<4x16xf32> -> vector<4x16xf32>
    %c2_162 = arith.constant 2 : index
    %c0_163 = arith.constant 0 : index
    %c0_164 = arith.constant 0 : index
    %283 = vector.load %arg28[%c2_162, %c0_163, %c0_164] : memref<3x16x16xbf16, #tpu.memory_space<vmem>>, vector<1x16x16xbf16>
    %284 = vector.shape_cast %283 : vector<1x16x16xbf16> to vector<16x16xbf16>
    %285 = arith.truncf %282 : vector<4x16xf32> to vector<4x16xbf16>
    %cst_165 = arith.constant dense<0.000000e+00> : vector<4x16xf32>
    %286 = tpu.matmul %285, %284, %cst_165 {dimension_numbers = #tpu.dot_dimension_numbers<[1], [0], [0], [1], [0, 0, 1, 1], [], []>} : vector<4x16xbf16>, vector<16x16xbf16>, vector<4x16xf32> -> vector<4x16xf32>
    %287 = arith.addf %270, %286 : vector<4x16xf32>
    %288 = tpu.iota {dimensions = array<i32: 0>} : vector<4x8xi32>
    %289 = tpu.iota {dimensions = array<i32: 1>} : vector<4x8xi32>
    %c2_i32_166 = arith.constant 2 : i32
    %290 = vector.broadcast %c2_i32_166 : i32 to vector<4x8xi32>
    %291 = arith.muli %290, %288 : vector<4x8xi32>
    %c0_i32_167 = arith.constant 0 : i32
    %292 = vector.broadcast %c0_i32_167 : i32 to vector<4x8xi32>
    %293 = arith.addi %291, %292 : vector<4x8xi32>
    %294 = arith.cmpi eq, %289, %293 : vector<4x8xi32>
    %cst_168 = arith.constant 1.000000e+00 : f32
    %cst_169 = arith.constant 0.000000e+00 : f32
    %295 = vector.broadcast %cst_168 : f32 to vector<4x8xf32>
    %296 = vector.broadcast %cst_169 : f32 to vector<4x8xf32>
    %297 = arith.select %294, %295, %296 : vector<4x8xi1>, vector<4x8xf32>
    %298 = arith.truncf %297 : vector<4x8xf32> to vector<4x8xbf16>
    %cst_170 = arith.constant dense<0.000000e+00> : vector<4x32xf32>
    %299 = tpu.matmul %298, %229, %cst_170 {dimension_numbers = #tpu.dot_dimension_numbers<[1], [0], [0], [1], [0, 0, 1, 1], [], []>} : vector<4x8xbf16>, vector<8x32xbf16>, vector<4x32xf32> -> vector<4x32xf32>
    %c0_171 = arith.constant 0 : index
    %c0_172 = arith.constant 0 : index
    %300 = vector.load %arg32[%c0_171, %c0_172] : memref<32x64xbf16, #tpu.memory_space<vmem>>, vector<32x64xbf16>
    %301 = arith.truncf %299 : vector<4x32xf32> to vector<4x32xbf16>
    %cst_173 = arith.constant dense<0.000000e+00> : vector<4x64xf32>
    %302 = tpu.matmul %301, %300, %cst_173 {dimension_numbers = #tpu.dot_dimension_numbers<[1], [0], [0], [1], [0, 0, 1, 1], [], []>} : vector<4x32xbf16>, vector<32x64xbf16>, vector<4x64xf32> -> vector<4x64xf32>
    %c0_174 = arith.constant 0 : index
    %c0_175 = arith.constant 0 : index
    %303 = vector.load %arg33[%c0_174, %c0_175] : memref<1x64xf32, #tpu.memory_space<vmem>>, vector<1x64xf32>
    %304 = vector.broadcast %303 : vector<1x64xf32> to vector<4x64xf32>
    %305 = arith.addf %302, %304 : vector<4x64xf32>
    %c0_176 = arith.constant 0 : index
    %c0_177 = arith.constant 0 : index
    %306 = vector.load %arg29[%c0_176, %c0_177] : memref<1x16xf32, #tpu.memory_space<vmem>>, vector<1x16xf32>
    %307 = vector.broadcast %306 : vector<1x16xf32> to vector<4x16xf32>
    %308 = arith.addf %287, %307 : vector<4x16xf32>
    %cst_178 = arith.constant 0.000000e+00 : f32
    %309 = vector.broadcast %cst_178 : f32 to vector<4x16xf32>
    %310 = arith.maximumf %308, %309 : vector<4x16xf32>
    %c0_179 = arith.constant 0 : index
    %c0_180 = arith.constant 0 : index
    %311 = vector.load %arg30[%c0_179, %c0_180] : memref<16x64xbf16, #tpu.memory_space<vmem>>, vector<16x64xbf16>
    %312 = arith.truncf %310 : vector<4x16xf32> to vector<4x16xbf16>
    %cst_181 = arith.constant dense<0.000000e+00> : vector<4x64xf32>
    %313 = tpu.matmul %312, %311, %cst_181 {dimension_numbers = #tpu.dot_dimension_numbers<[1], [0], [0], [1], [0, 0, 1, 1], [], []>} : vector<4x16xbf16>, vector<16x64xbf16>, vector<4x64xf32> -> vector<4x64xf32>
    %c0_182 = arith.constant 0 : index
    %c0_183 = arith.constant 0 : index
    %314 = vector.load %arg31[%c0_182, %c0_183] : memref<1x64xf32, #tpu.memory_space<vmem>>, vector<1x64xf32>
    %315 = vector.broadcast %314 : vector<1x64xf32> to vector<4x64xf32>
    %316 = arith.addf %313, %315 : vector<4x64xf32>
    %317 = arith.addf %316, %305 : vector<4x64xf32>
    %cst_184 = arith.constant 0.000000e+00 : f32
    %318 = vector.broadcast %cst_184 : f32 to vector<4x64xf32>
    %319 = arith.maximumf %317, %318 : vector<4x64xf32>
    %320 = arith.truncf %319 : vector<4x64xf32> to vector<4x64xbf16>
    %c0_185 = arith.constant 0 : index
    %c0_186 = arith.constant 0 : index
    %321 = vector.load %arg34[%c0_185, %c0_186] : memref<64x32xbf16, #tpu.memory_space<vmem>>, vector<64x32xbf16>
    %cst_187 = arith.constant dense<0.000000e+00> : vector<4x32xf32>
    %322 = tpu.matmul %320, %321, %cst_187 {dimension_numbers = #tpu.dot_dimension_numbers<[1], [0], [0], [1], [0, 0, 1, 1], [], []>} : vector<4x64xbf16>, vector<64x32xbf16>, vector<4x32xf32> -> vector<4x32xf32>
    %c0_188 = arith.constant 0 : index
    %c0_189 = arith.constant 0 : index
    %323 = vector.load %arg35[%c0_188, %c0_189] : memref<1x32xf32, #tpu.memory_space<vmem>>, vector<1x32xf32>
    %324 = vector.broadcast %323 : vector<1x32xf32> to vector<4x32xf32>
    %325 = arith.addf %322, %324 : vector<4x32xf32>
    %cst_190 = arith.constant 0.000000e+00 : f32
    %326 = vector.broadcast %cst_190 : f32 to vector<4x32xf32>
    %327 = arith.maximumf %325, %326 : vector<4x32xf32>
    %328 = arith.truncf %327 : vector<4x32xf32> to vector<4x32xbf16>
    %329 = tpu.iota {dimensions = array<i32: 0>} : vector<2x4xi32>
    %330 = tpu.iota {dimensions = array<i32: 1>} : vector<2x4xi32>
    %c2_i32_191 = arith.constant 2 : i32
    %331 = vector.broadcast %c2_i32_191 : i32 to vector<2x4xi32>
    %332 = arith.muli %331, %329 : vector<2x4xi32>
    %c-1_i32_192 = arith.constant -1 : i32
    %333 = vector.broadcast %c-1_i32_192 : i32 to vector<2x4xi32>
    %334 = arith.addi %332, %333 : vector<2x4xi32>
    %335 = arith.cmpi eq, %330, %334 : vector<2x4xi32>
    %cst_193 = arith.constant 1.000000e+00 : f32
    %cst_194 = arith.constant 0.000000e+00 : f32
    %336 = vector.broadcast %cst_193 : f32 to vector<2x4xf32>
    %337 = vector.broadcast %cst_194 : f32 to vector<2x4xf32>
    %338 = arith.select %335, %336, %337 : vector<2x4xi1>, vector<2x4xf32>
    %339 = arith.truncf %338 : vector<2x4xf32> to vector<2x4xbf16>
    %cst_195 = arith.constant dense<0.000000e+00> : vector<2x32xf32>
    %340 = tpu.matmul %339, %328, %cst_195 {dimension_numbers = #tpu.dot_dimension_numbers<[1], [0], [0], [1], [0, 0, 1, 1], [], []>} : vector<2x4xbf16>, vector<4x32xbf16>, vector<2x32xf32> -> vector<2x32xf32>
    %c0_196 = arith.constant 0 : index
    %c0_197 = arith.constant 0 : index
    %c0_198 = arith.constant 0 : index
    %341 = vector.load %arg36[%c0_196, %c0_197, %c0_198] : memref<3x32x32xbf16, #tpu.memory_space<vmem>>, vector<1x32x32xbf16>
    %342 = vector.shape_cast %341 : vector<1x32x32xbf16> to vector<32x32xbf16>
    %343 = arith.truncf %340 : vector<2x32xf32> to vector<2x32xbf16>
    %cst_199 = arith.constant dense<0.000000e+00> : vector<2x32xf32>
    %344 = tpu.matmul %343, %342, %cst_199 {dimension_numbers = #tpu.dot_dimension_numbers<[1], [0], [0], [1], [0, 0, 1, 1], [], []>} : vector<2x32xbf16>, vector<32x32xbf16>, vector<2x32xf32> -> vector<2x32xf32>
    %345 = tpu.iota {dimensions = array<i32: 0>} : vector<2x4xi32>
    %346 = tpu.iota {dimensions = array<i32: 1>} : vector<2x4xi32>
    %c2_i32_200 = arith.constant 2 : i32
    %347 = vector.broadcast %c2_i32_200 : i32 to vector<2x4xi32>
    %348 = arith.muli %347, %345 : vector<2x4xi32>
    %c0_i32_201 = arith.constant 0 : i32
    %349 = vector.broadcast %c0_i32_201 : i32 to vector<2x4xi32>
    %350 = arith.addi %348, %349 : vector<2x4xi32>
    %351 = arith.cmpi eq, %346, %350 : vector<2x4xi32>
    %cst_202 = arith.constant 1.000000e+00 : f32
    %cst_203 = arith.constant 0.000000e+00 : f32
    %352 = vector.broadcast %cst_202 : f32 to vector<2x4xf32>
    %353 = vector.broadcast %cst_203 : f32 to vector<2x4xf32>
    %354 = arith.select %351, %352, %353 : vector<2x4xi1>, vector<2x4xf32>
    %355 = arith.truncf %354 : vector<2x4xf32> to vector<2x4xbf16>
    %cst_204 = arith.constant dense<0.000000e+00> : vector<2x32xf32>
    %356 = tpu.matmul %355, %328, %cst_204 {dimension_numbers = #tpu.dot_dimension_numbers<[1], [0], [0], [1], [0, 0, 1, 1], [], []>} : vector<2x4xbf16>, vector<4x32xbf16>, vector<2x32xf32> -> vector<2x32xf32>
    %c1_205 = arith.constant 1 : index
    %c0_206 = arith.constant 0 : index
    %c0_207 = arith.constant 0 : index
    %357 = vector.load %arg36[%c1_205, %c0_206, %c0_207] : memref<3x32x32xbf16, #tpu.memory_space<vmem>>, vector<1x32x32xbf16>
    %358 = vector.shape_cast %357 : vector<1x32x32xbf16> to vector<32x32xbf16>
    %359 = arith.truncf %356 : vector<2x32xf32> to vector<2x32xbf16>
    %cst_208 = arith.constant dense<0.000000e+00> : vector<2x32xf32>
    %360 = tpu.matmul %359, %358, %cst_208 {dimension_numbers = #tpu.dot_dimension_numbers<[1], [0], [0], [1], [0, 0, 1, 1], [], []>} : vector<2x32xbf16>, vector<32x32xbf16>, vector<2x32xf32> -> vector<2x32xf32>
    %361 = arith.addf %344, %360 : vector<2x32xf32>
    %362 = tpu.iota {dimensions = array<i32: 0>} : vector<2x4xi32>
    %363 = tpu.iota {dimensions = array<i32: 1>} : vector<2x4xi32>
    %c2_i32_209 = arith.constant 2 : i32
    %364 = vector.broadcast %c2_i32_209 : i32 to vector<2x4xi32>
    %365 = arith.muli %364, %362 : vector<2x4xi32>
    %c1_i32_210 = arith.constant 1 : i32
    %366 = vector.broadcast %c1_i32_210 : i32 to vector<2x4xi32>
    %367 = arith.addi %365, %366 : vector<2x4xi32>
    %368 = arith.cmpi eq, %363, %367 : vector<2x4xi32>
    %cst_211 = arith.constant 1.000000e+00 : f32
    %cst_212 = arith.constant 0.000000e+00 : f32
    %369 = vector.broadcast %cst_211 : f32 to vector<2x4xf32>
    %370 = vector.broadcast %cst_212 : f32 to vector<2x4xf32>
    %371 = arith.select %368, %369, %370 : vector<2x4xi1>, vector<2x4xf32>
    %372 = arith.truncf %371 : vector<2x4xf32> to vector<2x4xbf16>
    %cst_213 = arith.constant dense<0.000000e+00> : vector<2x32xf32>
    %373 = tpu.matmul %372, %328, %cst_213 {dimension_numbers = #tpu.dot_dimension_numbers<[1], [0], [0], [1], [0, 0, 1, 1], [], []>} : vector<2x4xbf16>, vector<4x32xbf16>, vector<2x32xf32> -> vector<2x32xf32>
    %c2_214 = arith.constant 2 : index
    %c0_215 = arith.constant 0 : index
    %c0_216 = arith.constant 0 : index
    %374 = vector.load %arg36[%c2_214, %c0_215, %c0_216] : memref<3x32x32xbf16, #tpu.memory_space<vmem>>, vector<1x32x32xbf16>
    %375 = vector.shape_cast %374 : vector<1x32x32xbf16> to vector<32x32xbf16>
    %376 = arith.truncf %373 : vector<2x32xf32> to vector<2x32xbf16>
    %cst_217 = arith.constant dense<0.000000e+00> : vector<2x32xf32>
    %377 = tpu.matmul %376, %375, %cst_217 {dimension_numbers = #tpu.dot_dimension_numbers<[1], [0], [0], [1], [0, 0, 1, 1], [], []>} : vector<2x32xbf16>, vector<32x32xbf16>, vector<2x32xf32> -> vector<2x32xf32>
    %378 = arith.addf %361, %377 : vector<2x32xf32>
    %379 = tpu.iota {dimensions = array<i32: 0>} : vector<2x4xi32>
    %380 = tpu.iota {dimensions = array<i32: 1>} : vector<2x4xi32>
    %c2_i32_218 = arith.constant 2 : i32
    %381 = vector.broadcast %c2_i32_218 : i32 to vector<2x4xi32>
    %382 = arith.muli %381, %379 : vector<2x4xi32>
    %c0_i32_219 = arith.constant 0 : i32
    %383 = vector.broadcast %c0_i32_219 : i32 to vector<2x4xi32>
    %384 = arith.addi %382, %383 : vector<2x4xi32>
    %385 = arith.cmpi eq, %380, %384 : vector<2x4xi32>
    %cst_220 = arith.constant 1.000000e+00 : f32
    %cst_221 = arith.constant 0.000000e+00 : f32
    %386 = vector.broadcast %cst_220 : f32 to vector<2x4xf32>
    %387 = vector.broadcast %cst_221 : f32 to vector<2x4xf32>
    %388 = arith.select %385, %386, %387 : vector<2x4xi1>, vector<2x4xf32>
    %389 = arith.truncf %388 : vector<2x4xf32> to vector<2x4xbf16>
    %cst_222 = arith.constant dense<0.000000e+00> : vector<2x64xf32>
    %390 = tpu.matmul %389, %320, %cst_222 {dimension_numbers = #tpu.dot_dimension_numbers<[1], [0], [0], [1], [0, 0, 1, 1], [], []>} : vector<2x4xbf16>, vector<4x64xbf16>, vector<2x64xf32> -> vector<2x64xf32>
    %c0_223 = arith.constant 0 : index
    %c0_224 = arith.constant 0 : index
    %391 = vector.load %arg40[%c0_223, %c0_224] : memref<64x128xbf16, #tpu.memory_space<vmem>>, vector<64x128xbf16>
    %392 = arith.truncf %390 : vector<2x64xf32> to vector<2x64xbf16>
    %cst_225 = arith.constant dense<0.000000e+00> : vector<2x128xf32>
    %393 = tpu.matmul %392, %391, %cst_225 {dimension_numbers = #tpu.dot_dimension_numbers<[1], [0], [0], [1], [0, 0, 1, 1], [], []>} : vector<2x64xbf16>, vector<64x128xbf16>, vector<2x128xf32> -> vector<2x128xf32>
    %c0_226 = arith.constant 0 : index
    %c0_227 = arith.constant 0 : index
    %394 = vector.load %arg41[%c0_226, %c0_227] : memref<1x128xf32, #tpu.memory_space<vmem>>, vector<1x128xf32>
    %395 = vector.broadcast %394 : vector<1x128xf32> to vector<2x128xf32>
    %396 = arith.addf %393, %395 : vector<2x128xf32>
    %c0_228 = arith.constant 0 : index
    %c0_229 = arith.constant 0 : index
    %397 = vector.load %arg37[%c0_228, %c0_229] : memref<1x32xf32, #tpu.memory_space<vmem>>, vector<1x32xf32>
    %398 = vector.broadcast %397 : vector<1x32xf32> to vector<2x32xf32>
    %399 = arith.addf %378, %398 : vector<2x32xf32>
    %cst_230 = arith.constant 0.000000e+00 : f32
    %400 = vector.broadcast %cst_230 : f32 to vector<2x32xf32>
    %401 = arith.maximumf %399, %400 : vector<2x32xf32>
    %c0_231 = arith.constant 0 : index
    %c0_232 = arith.constant 0 : index
    %402 = vector.load %arg38[%c0_231, %c0_232] : memref<32x128xbf16, #tpu.memory_space<vmem>>, vector<32x128xbf16>
    %403 = arith.truncf %401 : vector<2x32xf32> to vector<2x32xbf16>
    %cst_233 = arith.constant dense<0.000000e+00> : vector<2x128xf32>
    %404 = tpu.matmul %403, %402, %cst_233 {dimension_numbers = #tpu.dot_dimension_numbers<[1], [0], [0], [1], [0, 0, 1, 1], [], []>} : vector<2x32xbf16>, vector<32x128xbf16>, vector<2x128xf32> -> vector<2x128xf32>
    %c0_234 = arith.constant 0 : index
    %c0_235 = arith.constant 0 : index
    %405 = vector.load %arg39[%c0_234, %c0_235] : memref<1x128xf32, #tpu.memory_space<vmem>>, vector<1x128xf32>
    %406 = vector.broadcast %405 : vector<1x128xf32> to vector<2x128xf32>
    %407 = arith.addf %404, %406 : vector<2x128xf32>
    %408 = arith.addf %407, %396 : vector<2x128xf32>
    %cst_236 = arith.constant 0.000000e+00 : f32
    %409 = vector.broadcast %cst_236 : f32 to vector<2x128xf32>
    %410 = arith.maximumf %408, %409 : vector<2x128xf32>
    %cst_237 = arith.constant dense<0.000000e+00> : vector<128xf32>
    %411 = vector.multi_reduction <add>, %410, %cst_237 [0] : vector<2x128xf32> to vector<128xf32>
    %412 = vector.shape_cast %411 : vector<128xf32> to vector<1x128xf32>
    %cst_238 = arith.constant 2.000000e+00 : f32
    %413 = vector.broadcast %cst_238 : f32 to vector<1x128xf32>
    %414 = arith.divf %412, %413 : vector<1x128xf32>
    %c0_239 = arith.constant 0 : index
    %c0_240 = arith.constant 0 : index
    %c0_241 = arith.constant 0 : index
    %415 = vector.load %arg42[%c0_239, %c0_240, %c0_241] : memref<1x1x128xf32, #tpu.memory_space<vmem>>, vector<1x1x128xf32>
    %416 = vector.shape_cast %415 : vector<1x1x128xf32> to vector<1x128xf32>
    %417 = vector.shape_cast %414 : vector<1x128xf32> to vector<1x1x128xf32>
    tpu.vector_store %arg42[%c0_239, %c0_240, %c0_241], %417 {strides = array<i32>} : memref<1x1x128xf32, #tpu.memory_space<vmem>>, vector<1x1x128xf32>,
    return
  }
  func.func @transform_0(%arg0: i32) -> (i32, i32, i32) {
    %c0_i32 = arith.constant 0 : i32
    %c0_i32_0 = arith.constant 0 : i32
    %c0_i32_1 = arith.constant 0 : i32
    return %arg0, %c0_i32, %c0_i32_0 : i32, i32, i32
  }
  func.func @transform_1(%arg0: i32) -> (i32, i32) {
    %c0_i32 = arith.constant 0 : i32
    %c0_i32_0 = arith.constant 0 : i32
    %c0_i32_1 = arith.constant 0 : i32
    return %c0_i32, %c0_i32_0 : i32, i32
  }
  func.func @transform_2(%arg0: i32) -> (i32, i32) {
    %c0_i32 = arith.constant 0 : i32
    %c0_i32_0 = arith.constant 0 : i32
    %c0_i32_1 = arith.constant 0 : i32
    return %c0_i32, %c0_i32_0 : i32, i32
  }
  func.func @transform_3(%arg0: i32) -> (i32, i32) {
    %c0_i32 = arith.constant 0 : i32
    %c0_i32_0 = arith.constant 0 : i32
    %c0_i32_1 = arith.constant 0 : i32
    return %c0_i32, %c0_i32_0 : i32, i32
  }
  func.func @transform_4(%arg0: i32) -> (i32, i32) {
    %c0_i32 = arith.constant 0 : i32
    %c0_i32_0 = arith.constant 0 : i32
    %c0_i32_1 = arith.constant 0 : i32
    return %c0_i32, %c0_i32_0 : i32, i32
  }
  func.func @transform_5(%arg0: i32) -> (i32, i32, i32) {
    %c0_i32 = arith.constant 0 : i32
    %c0_i32_0 = arith.constant 0 : i32
    %c0_i32_1 = arith.constant 0 : i32
    %c0_i32_2 = arith.constant 0 : i32
    return %c0_i32, %c0_i32_0, %c0_i32_1 : i32, i32, i32
  }
  func.func @transform_6(%arg0: i32) -> (i32, i32) {
    %c0_i32 = arith.constant 0 : i32
    %c0_i32_0 = arith.constant 0 : i32
    %c0_i32_1 = arith.constant 0 : i32
    return %c0_i32, %c0_i32_0 : i32, i32
  }
  func.func @transform_7(%arg0: i32) -> (i32, i32) {
    %c0_i32 = arith.constant 0 : i32
    %c0_i32_0 = arith.constant 0 : i32
    %c0_i32_1 = arith.constant 0 : i32
    return %c0_i32, %c0_i32_0 : i32, i32
  }
  func.func @transform_8(%arg0: i32) -> (i32, i32) {
    %c0_i32 = arith.constant 0 : i32
    %c0_i32_0 = arith.constant 0 : i32
    %c0_i32_1 = arith.constant 0 : i32
    return %c0_i32, %c0_i32_0 : i32, i32
  }
  func.func @transform_9(%arg0: i32) -> (i32, i32) {
    %c0_i32 = arith.constant 0 : i32
    %c0_i32_0 = arith.constant 0 : i32
    %c0_i32_1 = arith.constant 0 : i32
    return %c0_i32, %c0_i32_0 : i32, i32
  }
  func.func @transform_10(%arg0: i32) -> (i32, i32) {
    %c0_i32 = arith.constant 0 : i32
    %c0_i32_0 = arith.constant 0 : i32
    %c0_i32_1 = arith.constant 0 : i32
    return %c0_i32, %c0_i32_0 : i32, i32
  }
  func.func @transform_11(%arg0: i32) -> (i32, i32) {
    %c0_i32 = arith.constant 0 : i32
    %c0_i32_0 = arith.constant 0 : i32
    %c0_i32_1 = arith.constant 0 : i32
    return %c0_i32, %c0_i32_0 : i32, i32
  }
  func.func @transform_12(%arg0: i32) -> (i32, i32) {
    %c0_i32 = arith.constant 0 : i32
    %c0_i32_0 = arith.constant 0 : i32
    %c0_i32_1 = arith.constant 0 : i32
    return %c0_i32, %c0_i32_0 : i32, i32
  }
  func.func @transform_13(%arg0: i32) -> (i32, i32, i32) {
    %c0_i32 = arith.constant 0 : i32
    %c0_i32_0 = arith.constant 0 : i32
    %c0_i32_1 = arith.constant 0 : i32
    %c0_i32_2 = arith.constant 0 : i32
    return %c0_i32, %c0_i32_0, %c0_i32_1 : i32, i32, i32
  }
  func.func @transform_14(%arg0: i32) -> (i32, i32) {
    %c0_i32 = arith.constant 0 : i32
    %c0_i32_0 = arith.constant 0 : i32
    %c0_i32_1 = arith.constant 0 : i32
    return %c0_i32, %c0_i32_0 : i32, i32
  }
  func.func @transform_15(%arg0: i32) -> (i32, i32) {
    %c0_i32 = arith.constant 0 : i32
    %c0_i32_0 = arith.constant 0 : i32
    %c0_i32_1 = arith.constant 0 : i32
    return %c0_i32, %c0_i32_0 : i32, i32
  }
  func.func @transform_16(%arg0: i32) -> (i32, i32) {
    %c0_i32 = arith.constant 0 : i32
    %c0_i32_0 = arith.constant 0 : i32
    %c0_i32_1 = arith.constant 0 : i32
    return %c0_i32, %c0_i32_0 : i32, i32
  }
  func.func @transform_17(%arg0: i32) -> (i32, i32) {
    %c0_i32 = arith.constant 0 : i32
    %c0_i32_0 = arith.constant 0 : i32
    %c0_i32_1 = arith.constant 0 : i32
    return %c0_i32, %c0_i32_0 : i32, i32
  }
  func.func @transform_18(%arg0: i32) -> (i32, i32) {
    %c0_i32 = arith.constant 0 : i32
    %c0_i32_0 = arith.constant 0 : i32
    %c0_i32_1 = arith.constant 0 : i32
    return %c0_i32, %c0_i32_0 : i32, i32
  }
  func.func @transform_19(%arg0: i32) -> (i32, i32, i32) {
    %c0_i32 = arith.constant 0 : i32
    %c0_i32_0 = arith.constant 0 : i32
    %c0_i32_1 = arith.constant 0 : i32
    %c0_i32_2 = arith.constant 0 : i32
    return %c0_i32, %c0_i32_0, %c0_i32_1 : i32, i32, i32
  }
  func.func @transform_20(%arg0: i32) -> (i32, i32) {
    %c0_i32 = arith.constant 0 : i32
    %c0_i32_0 = arith.constant 0 : i32
    %c0_i32_1 = arith.constant 0 : i32
    return %c0_i32, %c0_i32_0 : i32, i32
  }
  func.func @transform_21(%arg0: i32) -> (i32, i32) {
    %c0_i32 = arith.constant 0 : i32
    %c0_i32_0 = arith.constant 0 : i32
    %c0_i32_1 = arith.constant 0 : i32
    return %c0_i32, %c0_i32_0 : i32, i32
  }
  func.func @transform_22(%arg0: i32) -> (i32, i32) {
    %c0_i32 = arith.constant 0 : i32
    %c0_i32_0 = arith.constant 0 : i32
    %c0_i32_1 = arith.constant 0 : i32
    return %c0_i32, %c0_i32_0 : i32, i32
  }
  func.func @transform_23(%arg0: i32) -> (i32, i32) {
    %c0_i32 = arith.constant 0 : i32
    %c0_i32_0 = arith.constant 0 : i32
    %c0_i32_1 = arith.constant 0 : i32
    return %c0_i32, %c0_i32_0 : i32, i32
  }
  func.func @transform_24(%arg0: i32) -> (i32, i32) {
    %c0_i32 = arith.constant 0 : i32
    %c0_i32_0 = arith.constant 0 : i32
    %c0_i32_1 = arith.constant 0 : i32
    return %c0_i32, %c0_i32_0 : i32, i32
  }
  func.func @transform_25(%arg0: i32) -> (i32, i32) {
    %c0_i32 = arith.constant 0 : i32
    %c0_i32_0 = arith.constant 0 : i32
    %c0_i32_1 = arith.constant 0 : i32
    return %c0_i32, %c0_i32_0 : i32, i32
  }
  func.func @transform_26(%arg0: i32) -> (i32, i32) {
    %c0_i32 = arith.constant 0 : i32
    %c0_i32_0 = arith.constant 0 : i32
    %c0_i32_1 = arith.constant 0 : i32
    return %c0_i32, %c0_i32_0 : i32, i32
  }
  func.func @transform_27(%arg0: i32) -> (i32, i32, i32) {
    %c0_i32 = arith.constant 0 : i32
    %c0_i32_0 = arith.constant 0 : i32
    %c0_i32_1 = arith.constant 0 : i32
    %c0_i32_2 = arith.constant 0 : i32
    return %c0_i32, %c0_i32_0, %c0_i32_1 : i32, i32, i32
  }
  func.func @transform_28(%arg0: i32) -> (i32, i32) {
    %c0_i32 = arith.constant 0 : i32
    %c0_i32_0 = arith.constant 0 : i32
    %c0_i32_1 = arith.constant 0 : i32
    return %c0_i32, %c0_i32_0 : i32, i32
  }
  func.func @transform_29(%arg0: i32) -> (i32, i32) {
    %c0_i32 = arith.constant 0 : i32
    %c0_i32_0 = arith.constant 0 : i32
    %c0_i32_1 = arith.constant 0 : i32
    return %c0_i32, %c0_i32_0 : i32, i32
  }
  func.func @transform_30(%arg0: i32) -> (i32, i32) {
    %c0_i32 = arith.constant 0 : i32
    %c0_i32_0 = arith.constant 0 : i32
    %c0_i32_1 = arith.constant 0 : i32
    return %c0_i32, %c0_i32_0 : i32, i32
  }
  func.func @transform_31(%arg0: i32) -> (i32, i32) {
    %c0_i32 = arith.constant 0 : i32
    %c0_i32_0 = arith.constant 0 : i32
    %c0_i32_1 = arith.constant 0 : i32
    return %c0_i32, %c0_i32_0 : i32, i32
  }
  func.func @transform_32(%arg0: i32) -> (i32, i32) {
    %c0_i32 = arith.constant 0 : i32
    %c0_i32_0 = arith.constant 0 : i32
    %c0_i32_1 = arith.constant 0 : i32
    return %c0_i32, %c0_i32_0 : i32, i32
  }
  func.func @transform_33(%arg0: i32) -> (i32, i32) {
    %c0_i32 = arith.constant 0 : i32
    %c0_i32_0 = arith.constant 0 : i32
    %c0_i32_1 = arith.constant 0 : i32
    return %c0_i32, %c0_i32_0 : i32, i32
  }
  func.func @transform_34(%arg0: i32) -> (i32, i32) {
    %c0_i32 = arith.constant 0 : i32
    %c0_i32_0 = arith.constant 0 : i32
    %c0_i32_1 = arith.constant 0 : i32
    return %c0_i32, %c0_i32_0 : i32, i32
  }
  func.func @transform_35(%arg0: i32) -> (i32, i32, i32) {
    %c0_i32 = arith.constant 0 : i32
    %c0_i32_0 = arith.constant 0 : i32
    %c0_i32_1 = arith.constant 0 : i32
    %c0_i32_2 = arith.constant 0 : i32
    return %c0_i32, %c0_i32_0, %c0_i32_1 : i32, i32, i32
  }
  func.func @transform_36(%arg0: i32) -> (i32, i32) {
    %c0_i32 = arith.constant 0 : i32
    %c0_i32_0 = arith.constant 0 : i32
    %c0_i32_1 = arith.constant 0 : i32
    return %c0_i32, %c0_i32_0 : i32, i32
  }
  func.func @transform_37(%arg0: i32) -> (i32, i32) {
    %c0_i32 = arith.constant 0 : i32
    %c0_i32_0 = arith.constant 0 : i32
    %c0_i32_1 = arith.constant 0 : i32
    return %c0_i32, %c0_i32_0 : i32, i32
  }
  func.func @transform_38(%arg0: i32) -> (i32, i32) {
    %c0_i32 = arith.constant 0 : i32
    %c0_i32_0 = arith.constant 0 : i32
    %c0_i32_1 = arith.constant 0 : i32
    return %c0_i32, %c0_i32_0 : i32, i32
  }
  func.func @transform_39(%arg0: i32) -> (i32, i32) {
    %c0_i32 = arith.constant 0 : i32
    %c0_i32_0 = arith.constant 0 : i32
    %c0_i32_1 = arith.constant 0 : i32
    return %c0_i32, %c0_i32_0 : i32, i32
  }
  func.func @transform_40(%arg0: i32) -> (i32, i32) {
    %c0_i32 = arith.constant 0 : i32
    %c0_i32_0 = arith.constant 0 : i32
    %c0_i32_1 = arith.constant 0 : i32
    return %c0_i32, %c0_i32_0 : i32, i32
  }
  func.func @transform_41(%arg0: i32) -> (i32, i32, i32) {
    %c0_i32 = arith.constant 0 : i32
    %c0_i32_0 = arith.constant 0 : i32
    %c0_i32_1 = arith.constant 0 : i32
    return %arg0, %c0_i32, %c0_i32_0 : i32, i32, i32
  }
}

</mosaic_0001>

<bundles_post_ra>
// kernel: resnet_forward.1
= control target key start
LH: loop header
LB: loop body
LE: loop exit
PB: predicated region body
PF: predicated region fallthrough
CT: control target
= control target key end

     0   :  { %s3056_s6 = smov 1   ;;  %s3057_s10 = smov 2   ;;  %s3625_s0 = inlined_call_operand.smem [shape: u32[42], index: -1, kind: input, shape index: {}] }
   0x1   :  { %s3107_s5 = sld [smem:[%s3625_s0]]   ;;  %s3058_s14 = smov 3  }
   0x2   :  { %s3112_s9 = sld [smem:[%s3625_s0 + %s3056_s6]]   ;;  %s3059_s18 = smov 4  }
   0x3   :  { %s3117_s13 = sld [smem:[%s3625_s0 + %s3057_s10]]   ;;  %s3060_s22 = smov 5  }
   0x4   :  { %s3122_s17 = sld [smem:[%s3625_s0 + %s3058_s14]]   ;;  %s3061_s26 = smov 6  }
   0x5   :  { %s3127_s21 = sld [smem:[%s3625_s0 + %s3059_s18]]   ;;  %s3062_s30 = smov 7  }
   0x6   :  { %s3132_s25 = sld [smem:[%s3625_s0 + %s3060_s22]]   ;;  %s3063_s4 = smov 8  }
   0x7   :  { %3640 = sst [smem:[#allocation5_spill]] %s3107_s5  ;;  %s3064_s10 = smov 9  }
   0x8   :  { %3641 = sst [smem:[#allocation6_spill]] %s3112_s9  ;;  %s3065_s15 = smov 10  }
   0x9   :  { %s3137_s29 = sld [smem:[%s3625_s0 + %s3061_s26]]   ;;  %s3066_s20 = smov 11  }
   0xa   :  { %s3142_s3 = sld [smem:[%s3625_s0 + %s3062_s30]]   ;;  %s3067_s26 = smov 12  }
   0xb   :  { %s3147_s8 = sld [smem:[%s3625_s0 + %s3063_s4]]   ;;  %s3068_s1 = smov 13  }
   0xc   :  { %s3152_s14 = sld [smem:[%s3625_s0 + %s3064_s10]]   ;;  %s3069_s7 = smov 14  }
   0xd   :  { %s3157_s19 = sld [smem:[%s3625_s0 + %s3065_s15]]   ;;  %s3070_s15 = smov 15  }
   0xe   :  { %s3162_s24 = sld [smem:[%s3625_s0 + %s3066_s20]]   ;;  %s3071_s22 = smov 16  }
   0xf   :  { %s3167_s30 = sld [smem:[%s3625_s0 + %s3067_s26]]   ;;  %s3072_s28 = smov 17  }
  0x10   :  { %3642 = sst [smem:[#allocation7_spill]] %s3142_s3 }
  0x11   :  { %3643 = sst [smem:[#allocation8_spill]] %s3147_s8 }
  0x12   :  { %s3172_s6 = sld [smem:[%s3625_s0 + %s3068_s1]]  }
  0x13   :  { %s3177_s12 = sld [smem:[%s3625_s0 + %s3069_s7]]   ;;  %s3073_s7 = smov 18  }
  0x14   :  { %s3182_s20 = sld [smem:[%s3625_s0 + %s3070_s15]]   ;;  %s3074_s15 = smov 19  }
  0x15   :  { %s3187_s27 = sld [smem:[%s3625_s0 + %s3071_s22]]   ;;  %s3075_s22 = smov 20  }
  0x16   :  { %s3192_s4 = sld [smem:[%s3625_s0 + %s3072_s28]]   ;;  %s3076_s28 = smov 21  }
  0x18   :  { %3644 = sst [smem:[#allocation9_spill]] %s3172_s6 }
  0x19   :  { %3645 = sst [smem:[#allocation10_spill]] %s3177_s12 }
  0x1a   :  { %3646 = sst [smem:[#allocation11_spill]] %s3182_s20 }
  0x1b   :  { %3647 = sst [smem:[#allocation12_spill]] %s3187_s27 }
  0x1c   :  { %3648 = sst [smem:[#allocation13_spill]] %s3192_s4 }
  0x1d   :  { %s3197_s12 = sld [smem:[%s3625_s0 + %s3073_s7]]   ;;  %s3077_s7 = smov 22  }
  0x1e   :  { %s3202_s20 = sld [smem:[%s3625_s0 + %s3074_s15]]   ;;  %s3078_s15 = smov 23  }
  0x1f   :  { %s3207_s27 = sld [smem:[%s3625_s0 + %s3075_s22]]   ;;  %s3079_s22 = smov 24  }
  0x20   :  { %s3212_s4 = sld [smem:[%s3625_s0 + %s3076_s28]]   ;;  %s3080_s28 = smov 25  }
  0x23   :  { %3649 = sst [smem:[#allocation14_spill]] %s3197_s12 }
  0x24   :  { %3650 = sst [smem:[#allocation15_spill]] %s3202_s20 }
  0x25   :  { %3651 = sst [smem:[#allocation16_spill]] %s3207_s27 }
  0x26   :  { %3652 = sst [smem:[#allocation17_spill]] %s3212_s4 }
  0x27   :  { %s3217_s12 = sld [smem:[%s3625_s0 + %s3077_s7]]   ;;  %s3081_s7 = smov 26  }
  0x28   :  { %s3222_s20 = sld [smem:[%s3625_s0 + %s3078_s15]]   ;;  %s3082_s15 = smov 27  }
  0x29   :  { %s3227_s27 = sld [smem:[%s3625_s0 + %s3079_s22]]   ;;  %s3083_s22 = smov 28  }
  0x2a   :  { %s3232_s4 = sld [smem:[%s3625_s0 + %s3080_s28]]   ;;  %s3084_s28 = smov 29  }
  0x2d   :  { %3653 = sst [smem:[#allocation18_spill]] %s3217_s12 }
  0x2e   :  { %3654 = sst [smem:[#allocation19_spill]] %s3222_s20 }
  0x2f   :  { %3655 = sst [smem:[#allocation20_spill]] %s3227_s27 }
  0x30   :  { %3656 = sst [smem:[#allocation21_spill]] %s3232_s4 }
  0x31   :  { %s3237_s12 = sld [smem:[%s3625_s0 + %s3081_s7]]   ;;  %s3085_s7 = smov 30  }
  0x32   :  { %s3242_s20 = sld [smem:[%s3625_s0 + %s3082_s15]]   ;;  %s3086_s15 = smov 31  }
  0x33   :  { %s3247_s27 = sld [smem:[%s3625_s0 + %s3083_s22]]   ;;  %s3087_s22 = smov 32  }
  0x34   :  { %s3252_s4 = sld [smem:[%s3625_s0 + %s3084_s28]]   ;;  %s3088_s28 = smov 33  }
  0x37   :  { %3657 = sst [smem:[#allocation22_spill]] %s3237_s12 }
  0x38   :  { %3658 = sst [smem:[#allocation23_spill]] %s3242_s20 }
  0x39   :  { %3659 = sst [smem:[#allocation24_spill]] %s3247_s27 }
  0x3a   :  { %3660 = sst [smem:[#allocation25_spill]] %s3252_s4 }
  0x3b   :  { %s3257_s12 = sld [smem:[%s3625_s0 + %s3085_s7]]   ;;  %s3089_s7 = smov 34  }
  0x3c   :  { %s3262_s20 = sld [smem:[%s3625_s0 + %s3086_s15]]   ;;  %s3090_s15 = smov 35  }
  0x3d   :  { %s3267_s27 = sld [smem:[%s3625_s0 + %s3087_s22]]   ;;  %s3091_s22 = smov 36  }
  0x3e   :  { %s3272_s4 = sld [smem:[%s3625_s0 + %s3088_s28]]   ;;  %s3092_s28 = smov 37  }
  0x41   :  { %3661 = sst [smem:[#allocation26_spill]] %s3257_s12 }
  0x42   :  { %3662 = sst [smem:[#allocation27_spill]] %s3262_s20 }
  0x43   :  { %3663 = sst [smem:[#allocation28_spill]] %s3267_s27 }
  0x44   :  { %3664 = sst [smem:[#allocation29_spill]] %s3272_s4 }
  0x45   :  { %s3277_s12 = sld [smem:[%s3625_s0 + %s3089_s7]]   ;;  %s3093_s7 = smov 38  }
  0x46   :  { %s3282_s20 = sld [smem:[%s3625_s0 + %s3090_s15]]   ;;  %s3094_s15 = smov 39  }
  0x47   :  { %s3287_s27 = sld [smem:[%s3625_s0 + %s3091_s22]]   ;;  %s3095_s22 = smov 40  }
  0x48   :  { %s3292_s4 = sld [smem:[%s3625_s0 + %s3092_s28]]   ;;  %s3096_s28 = smov 41  }
  0x4b   :  { %3665 = sst [smem:[#allocation30_spill]] %s3277_s12 }
  0x4c   :  { %3666 = sst [smem:[#allocation31_spill]] %s3282_s20 }
  0x4d   :  { %3667 = sst [smem:[#allocation32_spill]] %s3287_s27 }
  0x4e   :  { %3668 = sst [smem:[#allocation33_spill]] %s3292_s4 }
  0x4f   :  { %s3297_s12 = sld [smem:[%s3625_s0 + %s3093_s7]]  }
  0x50   :  { %s3302_s20 = sld [smem:[%s3625_s0 + %s3094_s15]]  }
  0x51   :  { %s3307_s27 = sld [smem:[%s3625_s0 + %s3095_s22]]  }
  0x52   :  { %s3312_s4 = sld [smem:[%s3625_s0 + %s3096_s28]]  }
  0x55   :  { %3669 = sst [smem:[#allocation34_spill]] %s3297_s12 }
  0x56   :  { %88 = vsyncpa [#allocation3], 0 }
  0x57   :  { %90 = vsyncpa [#allocation3 + $0x1], 0  ;;  %s3314_s7 = smov 0   ;;  %s3316_s10 = smov 0  }
  0x58   :  { %s3318_s11 = smov 0   ;;  %s3320_s15 = smov 0  }
  0x59 LB: > { %s3670_s9 = sld [smem:[#allocation6_spill]]  ;;  %s3335_s0 = sadd.s32 4294967295, %s3054_s15   ;;  %s3046_s10 = sphi %s3316_s10, %s3703_s10   ;;  %s3042_s7 = sphi %s3314_s7, %s3702_s7   ;;  %s3054_s15 = sphi %s3320_s15, %s3705_s15   ;;  %s3050_s11 = sphi %s3318_s11, %s3704_s11  }
  0x5a   : > { %s3671_s6 = sld [smem:[#allocation9_spill]]  ;;  %s2657_s16 = sadd.s32 4294967294, %s3054_s15  }
  0x5b   : > { %s3339_s18 = sadd.s32 1, %s3054_s15   ;;  %s969_s22 = sadd.s32 1, %s3050_s11 }
  0x5c   : > { %s966_s23 = ssub.s32 %s3054_s15, %s3339_s18  ;;  %p979_p0 = scmp.ne.s32.totalorder %s3050_s11, %s3046_s10 }
  0x5d   : > { %p967_p1 = scmp.eq.s32.totalorder %s966_s23, 0  ;;  %p980_p2 = scmp.eq.s32.totalorder %s3335_s0, 1 }
  0x5e   : > { %p985_p3 = scmp.ne.s32.totalorder %s3046_s10, %s3042_s7  ;;  %p986_p4 = scmp.eq.s32.totalorder %s2657_s16, 1 }
  0x5f   : > { %s3350_s26 = scalar_select %p967_p1, %s3050_s11, %s969_s22  }
  0x60   : > { %p3352_p5 = por %p980_p2, %p979_p0  ;;  %p3356_p6 = por %p986_p4, %p985_p3 }
  0x61   : > { %p2660_p7 = scmp.ge.s32.totalorder %s3054_s15, 1  ;;  %p1132_p8 = scmp.lt.s32.totalorder %s3054_s15, 3 }
  0x63   : > { %p1133_p9 = pnand %p2660_p7, %p1132_p8 }
  0x64   : > { %s3674_s5 = sld [smem:[#allocation5_spill]] (!%p1133_p9)  ;;  %p1231_p10 = scmp.lt.s32.totalorder (!%p1133_p9), %s3335_s0, 1 }
  0x65   : > { %1136 = sbr.rel (%p1133_p9) target bundleno = 3058 (0xbf2), region = 184  ;;  %s3675_s3 = sld [smem:[#allocation7_spill]] (!%p1133_p9) }
  0x66   : > { %s3676_s8 = sld [smem:[#allocation8_spill]] (!%p1133_p9) }
  0x67   : > { %s3677_s23 = sld [smem:[#allocation11_spill]] (!%p1133_p9) }
  0x68   : > { %s3701_s12 = sld [smem:[#allocation34_spill]] (!%p1133_p9) }
  0x6a   : > { %v1251_v0 = vld [vmem:[%s3670_s9 + $0x28] sm:$0x3]  ;;  %vm1298_vm0 = vcmask 1041408   ;;  %v2860_v4 = vld [vmem:[%s3670_s9 + $0x20] sm:$0xff]  ;;  %v2859_v5 = vld [vmem:[%s3670_s9 + $0x18] sm:$0xff]  ;;  %s1232_s2 = scalar_select %p1231_p10, %s3335_s0, 1  ;;  %v1325_v20 = vlaneseq }
  0x6b   : > { %v1279_v1 = vunpack.c.l.b16 %v1251_v0  ;;  %v2858_v6 = vld [vmem:[%s3670_s9 + $0x10] sm:$0xff]  ;;  %v2857_v7 = vld [vmem:[%s3670_s9 + $0x8] sm:$0xff]  ;;  %v2856_v8 = vld [vmem:[%s3670_s9] sm:$0xff]  ;;  %vm1291_vm1 = vcmask 687104   ;;  %v3097_v62 = vmov 0.0   ;;  %vm1382_vm7 = vcmask 261120  }
  0x6c   : > { %s2855_s16 = sshll.u32 %s1232_s2, 5  ;;  %v2970_v17 = vld [vmem:[%s3117_s13] ss:$0 sm:$0xff]  ;;  %v3373_v24 = vshrl.u32 %v1325_v20, 7  ;;  %v3383_v41 = vand.u32 127, %v1325_v20  ;;  %vm1406_vm8 = vcmask 31744  }
  0x6d   : > { %v1285_v2 = vpack.c.b16 %v1279_v1, %v1279_v1  ;;  %s1235_s22 = scalar_lea.vmem %s3674_s5, %s2855_s16  ;;  %vm1586_vm10 = vcmask 130048   ;;  %s3678_s2 = sld [smem:[#allocation10_spill]]  ;;  %vm1805_vm11 = vcmask 1043456   ;;  %vm1801_vm14 = vcmask 64512  }
  0x6e   : > { %v1237_v9 = vld [vmem:[%s1235_s22] sm:$0xff]  ;;  %v1238_v10 = vld [vmem:[%s1235_s22 + $0x8] sm:$0xff]  ;;  %v1239_v12 = vld [vmem:[%s1235_s22 + $0x10] sm:$0xff]  ;;  %v1329_v28 = vadd.s32 24, %v3373_v24  ;;  %v3377_v31 = vadd.s32 8, %v3373_v24  ;;  %vm1334_vm2 = vcmp.lt.s32.totalorder %v3373_v24, 1 }
  0x6f   : > { %v1300_v3 = vsel %vm1298_vm0, %v1285_v2, 0  ;;  %v1252_v11 = vpack.c.bf16 %v1238_v10, %v1237_v9  ;;  %v1240_v13 = vld [vmem:[%s1235_s22 + $0x18] sm:$0xff]  ;;  %vm1354_vm3 = vcmp.lt.s32.totalorder %v3373_v24, 7  ;;  %v3386_v42 = vmul.u32 2, %v3373_v24  ;;  %v2687_v10 = vld [vmem:[%s3132_s25 + $0x2] sm:$0x3] }
  0x70   : > { %1304 = vmatpush.bf16.msra.mxu0 %v1300_v3  ;;  %v1253_v14 = vpack.c.bf16 %v1240_v13, %v1239_v12  ;;  %vm1362_vm4 = vcmp.ge.s32.totalorder %v1329_v28, 31  ;;  %v1376_v43 = vmul.u32 2, %v3377_v31  ;;  %v1401_v3 = vld [vmem:[%s3122_s17] sm:$0x3]  ;;  %vm1485_vm9 = vcmp.ge.s32.totalorder %v3377_v31, 15  ;;  %s3679_s16 = sld [smem:[#allocation13_spill]] }
  0x71   : > { %vm1377_vm5 = vcmp.eq.s32.totalorder %v3383_v41, %v3386_v42  ;;  %v1438_v12 = vld [vmem:[%s3132_s25] sm:$0x3]  ;;  %s3680_s22 = sld [smem:[#allocation15_spill]]  ;;  %vm2250_vm15 = vcmask 523264  }
  0x72   : > { %vm1378_vm6 = vcmp.eq.s32.totalorder %v3383_v41, %v1376_v43  ;;  %v3409_v63 = vsel %vm1377_vm5, 1.0, %v3097_v62  ;;  %v1444_v13 = vsel %vm1298_vm0, %v1438_v12, 0  ;;  %v2699_v12 = vld [vmem:[%s3671_s6 + $0x2] sm:$0x3]  ;;  %s3687_s5 = sld [smem:[#allocation23_spill]] }
  0x73   : > { %v1380_v0 = vsel %vm1378_vm6, 1.0, %v3097_v62  ;;  %1453 = vmatpush.bf16.msra.mxu3 %v1444_v13  ;;  %v1641_v13 = vsel %vm1298_vm0, %v2699_v12, 0  ;;  %v2976_v31 = vld [vmem:[%s3678_s2] ss:$0 sm:$0xff]  ;;  %s3684_s2 = sld [smem:[#allocation17_spill]] }
  0x74   : > { %1305 = vmatpush.bf16.msra.mxu0 %v2860_v4  ;;  %v1381_v2 = vpack.c.bf16 %v1380_v0, %v3409_v63  ;;  %v1513_v4 = vld [vmem:[%s3152_s14] sm:$0x3] }
  0x75   : > { %v2971_v0 = vld [vmem:[%s3157_s19] ss:$0 sm:$0xff] }
  0x78   : > { %1306 = vmatpush.bf16.msra.mxu0 %v2859_v5  ;;  %v1411_v5 = vsel %vm1298_vm0, %v1401_v3, 0 }
  0x79   : > { %1420 = vmatpush.bf16.msra.mxu2 %v1411_v5 }
  0x7c   : > { %1307 = vmatpush.bf16.msra.mxu0 %v2858_v6  ;;  %v1519_v6 = vsel %vm1298_vm0, %v1513_v4, 0 }
  0x80   : > { %1308 = vmatpush.bf16.msra.mxu0 %v2857_v7 }
  0x84   : > { %1309 = vmatpush.bf16.msra.mxu0 %v2856_v8 }
  0x87   : > { %2683 = vmatmul.msk.bf16.vlgmr.msra.gmra.mxu0 %vm1291_vm1, %v1252_v11  ;;  %v1464_v11 = vsel %vm1298_vm0, %v2687_v10, 0 }
  0x88   : > { %1473 = vmatpush.bf16.msrb.mxu2 %v1464_v11 }
  0x97   : > { %2684 = vmatmul.msk.bf16.gmra.mxu0 %vm1291_vm1, %v1253_v14  ;;  %v2690_v14 = vld [vmem:[%s3132_s25 + $0x4] sm:$0x3] }
 0x104   : > { %v1311_v15 = vpop.f32.mrf.mxu0 }
 0x105   : > { %v1312_v22 = vadd.f32 %v2970_v17, %v1311_v15  ;;  %v1495_v15 = vsel %vm1298_vm0, %v2690_v14, 0  ;;  %v1615_v14 = vld [vmem:[%s3671_s6] sm:$0x3] }
 0x106   : > { %1504 = vmatpush.bf16.msrb.mxu3 %v1495_v15  ;;  %v2702_v15 = vld [vmem:[%s3671_s6 + $0x4] sm:$0x3]  ;;  %s3690_s6 = sld [smem:[#allocation22_spill]] }
 0x107   : > { %v1321_v26 = vmax.f32 %v1312_v22, 0.0 }
 0x109   : > { %v1330_v34 = vrot.slane %v1321_v26, 7  ;;  %v1350_v35 = vrot.slane %v1321_v26, 1 }
 0x10c   : > { %v1313_v16 = vpop.f32.mrf.mxu0 }
 0x10d   : > { %v1314_v21 = vadd.f32 %v2970_v17, %v1313_v16 }
 0x10f   : > { %v1322_v25 = vmax.f32 %v1314_v21, 0.0 }
 0x111   : > { %v1331_v32 = vrot.slane %v1322_v25, 7  ;;  %v1351_v40 = vrot.slane %v1322_v25, 1 }
 0x113   : > { %v1337_v52 = vsel %vm1334_vm2, %v1330_v34, %v1331_v32  ;;  %v1357_v57 = vsel %vm1354_vm3, %v1350_v35, %v1351_v40 }
 0x114   : > { %v1316_v18 = vpop.f32.mrf.mxu0  ;;  %v1347_v59 = vmax.f32 %v1322_v25, %v1337_v52 }
 0x115   : > { %v1317_v19 = vadd.f32 %v2970_v17, %v1316_v18 }
 0x117   : > { %v1323_v23 = vmax.f32 %v1317_v19, 0.0 }
 0x119   : > { %v1332_v29 = vrot.slane %v1323_v23, 7  ;;  %v1352_v36 = vrot.slane %v1323_v23, 1 }
 0x11b   : > { %v1336_v39 = vsel %vm1334_vm2, %v1331_v32, %v1332_v29  ;;  %v1356_v56 = vsel %vm1354_vm3, %v1351_v40, %v1352_v36 }
 0x11c   : > { %v1318_v27 = vpop.f32.mrf.mxu0  ;;  %v1348_v48 = vmax.f32 %v1323_v23, %v1336_v39  ;;  %v1368_v61 = vmax.f32 %v1347_v59, %v1356_v56 }
 0x11d   : > { %v1319_v30 = vadd.f32 %v2970_v17, %v1318_v27  ;;  %v2972_v17 = vld [vmem:[%s3127_s21] ss:$0 sm:$0xff] }
 0x11f   : > { %v1324_v33 = vmax.f32 %v1319_v30, 0.0 }
 0x121   : > { %v1333_v37 = vrot.slane %v1324_v33, 7  ;;  %v1353_v38 = vrot.slane %v1324_v33, 1 }
 0x123   : > { %v1335_v44 = vsel %vm1334_vm2, %v1332_v29, %v1333_v37  ;;  %v1355_v45 = vsel %vm1354_vm3, %v1352_v36, %v1353_v38  ;;  %v1358_v46 = vsel %vm1354_vm3, %v1353_v38, %v1350_v35  ;;  %v1338_v47 = vsel %vm1334_vm2, %v1333_v37, %v1330_v34  ;;  %v1543_v38 = vld [vmem:[%s3675_s3] sm:$0x3]  ;;  %s3681_s3 = sld [smem:[#allocation12_spill]] }
 0x124   : > { %v1349_v49 = vmax.f32 %v1324_v33, %v1335_v44  ;;  %v1366_v50 = vsel %vm1362_vm4, -inf, %v1358_v46  ;;  %v1342_v51 = vsel %vm1334_vm2, -inf, %v1338_v47  ;;  %v1369_v54 = vmax.f32 %v1348_v48, %v1355_v45  ;;  %v2973_v48 = vld [vmem:[%s3137_s29] ss:$0 sm:$0xff] }
 0x125   : > { %v1346_v53 = vmax.f32 %v1321_v26, %v1342_v51  ;;  %v1553_v39 = vsel %vm1298_vm0, %v1543_v38, 0 }
 0x126   : > { %v1370_v55 = vmax.f32 %v1349_v49, %v1366_v50 }
 0x127   : > { %v1367_v60 = vmax.f32 %v1346_v53, %v1357_v57 }
 0x128   : > { %v1372_v58 = vpack.c.bf16 %v1370_v55, %v1369_v54 }
 0x129   : > { %v1371_v1 = vpack.c.bf16 %v1368_v61, %v1367_v60  ;;  %v2974_v61 = vld [vmem:[%s3676_s8] ss:$0 sm:$0xff] }
 0x12a   : > { %1392 = vmatpush.bf16.msra.mxu1 %v1372_v58  ;;  %v2861_v58 = vld [vmem:[%s3162_s24] sm:$0xff] }
 0x12e   : > { %1393 = vmatpush.bf16.msra.mxu1 %v1371_v1 }
 0x131   : > { %2685 = vmatmul.msk.bf16.vlgmr.msra.gmra.mxu1 %vm1382_vm7, %v1381_v2 }
 0x132   : > { %1528 = vmatpush.bf16.msrb.mxu1 %v1519_v6 }
 0x1ae   : > { %v1395_v7 = vpop.f32.mrf.mxu1 }
 0x1b6   : > { %v1397_v8 = vpop.f32.mrf.mxu1 }
 0x1b7   : > { %v1400_v9 = vpack.c.bf16 %v1397_v8, %v1395_v7 }
 0x1b9   : > { %2686 = vmatmul.msk.bf16.vlgmr.msra.gmra.mxu2 %vm1406_vm8, %v1400_v9  ;;  %2692 = vmatmul.msk.bf16.vlgmr.msrb.gmra.mxu1 %vm1406_vm8, %v1400_v9 }
 0x1ba   : > { %1562 = vmatpush.bf16.msra.mxu2 %v1553_v39 }
 0x236   : > { %v1530_v59 = vpop.f32.mrf.mxu1 }
 0x237   : > { %v1531_v3 = vadd.f32 %v2971_v0, %v1530_v59  ;;  %v2712_v59 = vld [vmem:[%s3680_s22 + $0x4] sm:$0xf] }
 0x23c   : > { %v1422_v16 = vpop.f32.mrf.mxu2 }
 0x23d   : > { %v1423_v18 = vadd.f32 %v2972_v17, %v1422_v16  ;;  %v1621_v16 = vsel %vm1298_vm0, %v1615_v14, 0 }
 0x23e   : > { %v1532_v2 = vpop.f32.mrf.mxu1  ;;  %1630 = vmatpush.bf16.msra.mxu1 %v1621_v16 }
 0x23f   : > { %v1427_v20 = vmax.f32 %v1423_v18, 0.0  ;;  %v1533_v5 = vadd.f32 %v2971_v0, %v1532_v2  ;;  %v2975_v18 = vld [vmem:[%s3167_s30] ss:$0 sm:$0xff] }
 0x240   : > { %v2977_v0 = vld [vmem:[%s3681_s3] ss:$0 sm:$0xff]  ;;  %s3683_s3 = sld [smem:[#allocation19_spill]] }
 0x241   : > { %v1432_v23 = vrot.slane %v1427_v20, 7  ;;  %v1480_v33 = vrot.slane %v1427_v20, 1 }
 0x244   : > { %v1424_v19 = vpop.f32.mrf.mxu2 }
 0x245   : > { %v1425_v21 = vadd.f32 %v2972_v17, %v1424_v19  ;;  %v1670_v17 = vsel %vm1298_vm0, %v2702_v15, 0  ;;  %v1759_v15 = vadd.s32 4294967295, %v3386_v42 }
 0x247   : > { %v1428_v22 = vmax.f32 %v1425_v21, 0.0  ;;  %vm1760_vm12 = vcmp.eq.s32.totalorder %v3383_v41, %v1759_v15 }
 0x249   : > { %v1431_v25 = vpack.c.bf16 %v1428_v22, %v1427_v20  ;;  %v1433_v26 = vrot.slane %v1428_v22, 7  ;;  %v1481_v32 = vrot.slane %v1428_v22, 1 }
 0x24b   : > { %2689 = vmatmul.msk.bf16.vlgmr.msrb.gmra.mxu2 %vm1406_vm8, %v1431_v25  ;;  %v1434_v27 = vsel %vm1334_vm2, %v1432_v23, %v1433_v26  ;;  %v1435_v28 = vsel %vm1334_vm2, %v1433_v26, %v1432_v23  ;;  %v1483_v34 = vsel %vm1354_vm3, %v1481_v32, %v1480_v33  ;;  %v1482_v35 = vsel %vm1354_vm3, %v1480_v33, %v1481_v32 }
 0x24c   : > { %v1436_v29 = vsel %vm1334_vm2, 0.0, %v1435_v28  ;;  %v1487_v36 = vsel %vm1485_vm9, 0.0, %v1483_v34  ;;  %1650 = vmatpush.bf16.msrb.mxu2 %v1641_v13 }
 0x24d   : > { %v1439_v30 = vpack.c.bf16 %v1434_v27, %v1436_v29  ;;  %v1490_v37 = vpack.c.bf16 %v1487_v36, %v1482_v35 }
 0x24f   : > { %2688 = vmatmul.msk.bf16.vlgmr.msra.gmra.mxu3 %vm1406_vm8, %v1439_v30 }
 0x250   : > { %1597 = vmatpush.bf16.msra.mxu3 %v2861_v58  ;;  %v2862_v58 = vld [vmem:[%s3679_s16] sm:$0xff]  ;;  %s3685_s16 = sld [smem:[#allocation16_spill]] }
 0x251   : > { %1749 = vmatpush.bf16.msrb.mxu1 %v2862_v58 }
 0x25f   : > { %2691 = vmatmul.msk.bf16.vlgmr.msrb.gmra.mxu3 %vm1406_vm8, %v1490_v37 }
 0x260   : > { %1679 = vmatpush.bf16.msrb.mxu3 %v1670_v17 }
 0x2ce   : > { %v1475_v44 = vpop.f32.mrf.mxu2 }
 0x2d2   : > { %v1455_v40 = vpop.f32.mrf.mxu3 }
 0x2d3   : > { %v1476_v46 = vadd.f32 %v1475_v44, %v1455_v40  ;;  %v1696_v40 = vld [vmem:[%s3677_s23] sm:$0x3]  ;;  %s3682_s23 = sld [smem:[#allocation14_spill]] }
 0x2d6   : > { %v1477_v49 = vpop.f32.mrf.mxu2 }
 0x2d9   : > { %v2978_v14 = vld [vmem:[%s3682_s23] ss:$0 sm:$0xff]  ;;  %s3686_s23 = sld [smem:[#allocation21_spill]] }
 0x2da   : > { %v1457_v43 = vpop.f32.mrf.mxu3 }
 0x2db   : > { %v1478_v50 = vadd.f32 %v1477_v49, %v1457_v43  ;;  %v1706_v43 = vsel %vm1298_vm0, %v1696_v40, 0 }
 0x2dc   : > { %1715 = vmatpush.bf16.msrb.mxu0 %v1706_v43 }
 0x2e2   : > { %v1506_v45 = vpop.f32.mrf.mxu3 }
 0x2e3   : > { %v1511_v47 = vadd.f32 %v1506_v45, %v1476_v46 }
 0x2e5   : > { %v1539_v52 = vadd.f32 %v2973_v48, %v1511_v47 }
 0x2e7   : > { %v1541_v55 = vmax.f32 %v1539_v52, 0.0 }
 0x2ea   : > { %v1508_v51 = vpop.f32.mrf.mxu3 }
 0x2eb   : > { %v1512_v53 = vadd.f32 %v1508_v51, %v1478_v50 }
 0x2ed   : > { %v1540_v54 = vadd.f32 %v2973_v48, %v1512_v53 }
 0x2ef   : > { %v1542_v56 = vmax.f32 %v1540_v54, 0.0 }
 0x2f1   : > { %v1544_v57 = vpack.c.bf16 %v1542_v56, %v1541_v55 }
 0x2f3   : > { %2693 = vmatmul.msk.bf16.vlgmr.msra.gmra.mxu2 %vm1406_vm8, %v1544_v57 }
 0x376   : > { %v1564_v60 = vpop.f32.mrf.mxu2 }
 0x377   : > { %v1565_v1 = vadd.f32 %v2974_v61, %v1564_v60  ;;  %v1807_v60 = vsel %vm1805_vm11, %v2712_v59, 0 }
 0x378   : > { %1816 = vmatpush.bf16.msra.mxu0 %v1807_v60 }
 0x379   : > { %v3450_v6 = vadd.f32 %v1565_v1, %v1531_v3 }
 0x37b   : > { %v1571_v9 = vmax.f32 %v3450_v6, 0.0 }
 0x37e   : > { %v1566_v4 = vpop.f32.mrf.mxu2 }
 0x37f   : > { %v1567_v7 = vadd.f32 %v2974_v61, %v1566_v4 }
 0x381   : > { %v3452_v8 = vadd.f32 %v1567_v7, %v1533_v5 }
 0x383   : > { %v1572_v10 = vmax.f32 %v3452_v8, 0.0  ;;  %v1761_v8 = vsel %vm1760_vm12, 1.0, %v3097_v62 }
 0x385   : > { %v1573_v11 = vpack.c.bf16 %v1572_v10, %v1571_v9 }
 0x387   : > { %2698 = vmatmul.msk.bf16.vlgmr.msra.gmra.mxu3 %vm1586_vm10, %v1573_v11 }
 0x40a   : > { %v1599_v19 = vpop.f32.mrf.mxu3 }
 0x40b   : > { %v1600_v20 = vadd.f32 %v2975_v18, %v1599_v19  ;;  %v3502_v19 = vpack.c.bf16 %v3409_v63, %v3409_v63  ;;  %v1779_v63 = vld [vmem:[%s3680_s22] sm:$0xf] }
 0x40d   : > { %v1604_v21 = vmax.f32 %v1600_v20, 0.0  ;;  %v3504_v20 = vpack.c.bf16 %v1761_v8, %v1761_v8 }
 0x40f   : > { %v1609_v26 = vrot.slane %v1604_v21, 7  ;;  %v1657_v27 = vrot.slane %v1604_v21, 1 }
 0x412   : > { %v1601_v22 = vpop.f32.mrf.mxu3 }
 0x413   : > { %v1602_v23 = vadd.f32 %v2975_v18, %v1601_v22 }
 0x415   : > { %v1605_v25 = vmax.f32 %v1602_v23, 0.0 }
 0x417   : > { %v1608_v28 = vpack.c.bf16 %v1605_v25, %v1604_v21  ;;  %v1610_v29 = vrot.slane %v1605_v25, 7  ;;  %v1658_v30 = vrot.slane %v1605_v25, 1  ;;  %v1841_v21 = vadd.s32 1, %v3386_v42 }
 0x418   : > { %v1826_v25 = vsel %vm1805_vm11, %v1779_v63, 0 }
 0x419   : > { %v1611_v32 = vsel %vm1334_vm2, %v1609_v26, %v1610_v29  ;;  %v1612_v33 = vsel %vm1334_vm2, %v1610_v29, %v1609_v26  ;;  %v1659_v34 = vsel %vm1354_vm3, %v1657_v27, %v1658_v30  ;;  %v1660_v35 = vsel %vm1354_vm3, %v1658_v30, %v1657_v27  ;;  %2701 = vmatmul.msk.bf16.vlgmr.msrb.gmra.mxu2 %vm1406_vm8, %v1608_v28  ;;  %v2716_v26 = vld [vmem:[%s3680_s22 + $0x8] sm:$0xf] }
 0x41a   : > { %v1613_v36 = vsel %vm1334_vm2, 0.0, %v1612_v33  ;;  %v1662_v37 = vsel %vm1485_vm9, 0.0, %v1660_v35  ;;  %vm1842_vm13 = vcmp.eq.s32.totalorder %v3383_v41, %v1841_v21  ;;  %v1868_v27 = vsel %vm1805_vm11, %v2716_v26, 0  ;;  %v2863_v35 = vld [vmem:[%s3683_s3] sm:$0xff]  ;;  %s3688_s3 = sld [smem:[#allocation20_spill]] }
 0x41b   : > { %v1616_v38 = vpack.c.bf16 %v1611_v32, %v1613_v36  ;;  %v1665_v39 = vpack.c.bf16 %v1662_v37, %v1659_v34  ;;  %v1843_v22 = vsel %vm1842_vm13, 1.0, %v3097_v62  ;;  %v1932_v36 = vld [vmem:[%s3684_s2] sm:$0xf]  ;;  %s3689_s2 = sld [smem:[#allocation18_spill]] }
 0x41c   : > { %v3513_v23 = vpack.c.bf16 %v1843_v22, %v1843_v22  ;;  %v1942_v37 = vsel %vm1805_vm11, %v1932_v36, 0 }
 0x41d   : > { %2700 = vmatmul.msk.bf16.vlgmr.msra.gmra.mxu1 %vm1406_vm8, %v1616_v38  ;;  %2703 = vmatmul.msk.bf16.vlgmr.msrb.gmra.mxu3 %vm1406_vm8, %v1665_v39 }
 0x41e   : > { %1835 = vmatpush.bf16.msra.mxu1 %v1826_v25 }
 0x420   : > { %v2980_v58 = vld [vmem:[%s3688_s3] ss:$0 sm:$0xff]  ;;  %s3693_s3 = sld [smem:[#allocation24_spill]] }
 0x421   : > { %v2981_v59 = vld [vmem:[%s3689_s2] ss:$0 sm:$0xff]  ;;  %s3694_s2 = sld [smem:[#allocation29_spill]] }
 0x49a   : > { %v1632_v44 = vpop.f32.mrf.mxu1 }
 0x49c   : > { %v1652_v45 = vpop.f32.mrf.mxu2 }
 0x49d   : > { %v1653_v24 = vadd.f32 %v1652_v45, %v1632_v44 }
 0x4a0   : > { %v1681_v46 = vpop.f32.mrf.mxu3 }
 0x4a1   : > { %v1686_v48 = vadd.f32 %v1681_v46, %v1653_v24  ;;  %v2979_v24 = vld [vmem:[%s3685_s16] ss:$0 sm:$0xff]  ;;  %s3692_s16 = sld [smem:[#allocation25_spill]] }
 0x4a2   : > { %v1634_v49 = vpop.f32.mrf.mxu1 }
 0x4a3   : > { %v1692_v52 = vadd.f32 %v2976_v31, %v1686_v48 }
 0x4a4   : > { %v1654_v47 = vpop.f32.mrf.mxu2 }
 0x4a5   : > { %v1655_v50 = vadd.f32 %v1654_v47, %v1634_v49  ;;  %v1694_v55 = vmax.f32 %v1692_v52, 0.0 }
 0x4a8   : > { %v1683_v51 = vpop.f32.mrf.mxu3 }
 0x4a9   : > { %v1687_v53 = vadd.f32 %v1683_v51, %v1655_v50 }
 0x4ab   : > { %v1693_v54 = vadd.f32 %v2976_v31, %v1687_v53  ;;  %v2865_v53 = vld [vmem:[%s3686_s23 + $0x8] sm:$0xff] }
 0x4ad   : > { %v1695_v56 = vmax.f32 %v1693_v54, 0.0  ;;  %v2864_v54 = vld [vmem:[%s3686_s23] sm:$0xff] }
 0x4af   : > { %v1697_v57 = vpack.c.bf16 %v1695_v56, %v1694_v55  ;;  %v2867_v55 = vld [vmem:[%s3687_s5 + $0x8] sm:$0xff] }
 0x4b1   : > { %2704 = vmatmul.msk.bf16.vlgmr.msrb.gmra.mxu0 %vm1406_vm8, %v1697_v57 }
 0x52e   : > { %v1717_v61 = vpop.f32.mrf.mxu0 }
 0x52f   : > { %v1718_v1 = vadd.f32 %v2977_v0, %v1717_v61 }
 0x531   : > { %v1722_v3 = vadd.f32 %v1718_v1, %v1571_v9 }
 0x533   : > { %v1724_v7 = vmax.f32 %v1722_v3, 0.0 }
 0x536   : > { %v1719_v2 = vpop.f32.mrf.mxu0 }
 0x537   : > { %v1720_v4 = vadd.f32 %v2977_v0, %v1719_v2 }
 0x539   : > { %v1723_v5 = vadd.f32 %v1720_v4, %v1572_v10 }
 0x53b   : > { %v1725_v11 = vmax.f32 %v1723_v5, 0.0 }
 0x53d   : > { %v1726_v12 = vpack.c.bf16 %v1725_v11, %v1724_v7  ;;  %v2982_v7 = vld [vmem:[%s3690_s6] ss:$0 sm:$0xff]  ;;  %s3691_s6 = sld [smem:[#allocation27_spill]] }
 0x53f   : > { %2709 = vmatmul.msk.bf16.vlgmr.msrb.gmra.mxu1 %vm1586_vm10, %v1726_v12  ;;  %1891 = vmatpush.bf16.msrb.mxu0 %v1726_v12 }
 0x540   : > { %1920 = vmatpush.bf16.msrb.mxu1 %v2863_v35 }
 0x5bc   : > { %v1751_v13 = vpop.f32.mrf.mxu1 }
 0x5bd   : > { %v1752_v16 = vadd.f32 %v2978_v14, %v1751_v13 }
 0x5bf   : > { %v1756_v9 = vmax.f32 %v1752_v16, 0.0 }
 0x5c4   : > { %v1753_v17 = vpop.f32.mrf.mxu1 }
 0x5c5   : > { %v1754_v6 = vadd.f32 %v2978_v14, %v1753_v17  ;;  %v2866_v17 = vld [vmem:[%s3687_s5] sm:$0xff] }
 0x5c7   : > { %v1757_v18 = vmax.f32 %v1754_v6, 0.0  ;;  %v2868_v6 = vld [vmem:[%s3687_s5 + $0x10] sm:$0xff]  ;;  %s3695_s5 = sld [smem:[#allocation31_spill]] }
 0x5c9   : > { %v1758_v10 = vpack.c.bf16 %v1757_v18, %v1756_v9 }
 0x5cb   : > { %1773 = vmatpush.bf16.msra.mxu2 %v1758_v10  ;;  %1792 = vmatpush.bf16.msra.mxu3 %v1758_v10 }
 0x5ce   : > { %2710 = vmatmul.msk.bf16.vlgmr.msra.gmra.mxu2 %vm1586_vm10, %v3504_v20  ;;  %2711 = vmatmul.msk.bf16.vlgmr.msra.gmra.mxu3 %vm1586_vm10, %v3502_v19 }
 0x5cf   : > { %1855 = vmatpush.bf16.msrb.mxu2 %v1758_v10  ;;  %1877 = vmatpush.bf16.msrb.mxu3 %v1868_v27  ;;  %v2870_v27 = vld [vmem:[%s3691_s6 + $0x8] sm:$0xff] }
 0x5d3   : > { %1951 = vmatpush.bf16.msra.mxu2 %v1942_v37  ;;  %1989 = vmatpush.bf16.msra.mxu3 %v2865_v53 }
 0x5d7   : > { %1990 = vmatpush.bf16.msra.mxu3 %v2864_v54 }
 0x5de   : > { %2715 = vmatmul.msk.bf16.vlgmr.msrb.gmra.mxu2 %vm1586_vm10, %v3513_v23 }
 0x5df   : > { %2054 = vmatpush.bf16.msrb.mxu2 %v2867_v55 }
 0x651   : > { %v1775_v28 = vpop.f32.mrf.mxu2  ;;  %v1794_v42 = vpop.f32.mrf.mxu3 }
 0x652   : > { %v1780_v41 = vpack.c.bf16 %v1775_v28, %v1775_v28  ;;  %v1800_v62 = vpack.c.bf16 %v1794_v42, %v1794_v42  ;;  %v2869_v28 = vld [vmem:[%s3691_s6] sm:$0xff]  ;;  %s3697_s6 = sld [smem:[#allocation28_spill]] }
 0x653   : > { %v2871_v42 = vld [vmem:[%s3692_s16] sm:$0xff]  ;;  %s3696_s16 = sld [smem:[#allocation26_spill]] }
 0x654   : > { %2713 = vmatmul.msk.bf16.vlgmr.msra.gmra.mxu0 %vm1801_vm14, %v1800_v62  ;;  %2714 = vmatmul.msk.bf16.vlgmr.msra.gmra.mxu1 %vm1801_vm14, %v1780_v41 }
 0x659   : > { %v1777_v29 = vpop.f32.mrf.mxu2  ;;  %v1796_v30 = vpop.f32.mrf.mxu3 }
 0x661   : > { %v1857_v32 = vpop.f32.mrf.mxu2 }
 0x662   : > { %v1863_v33 = vpack.c.bf16 %v1857_v32, %v1857_v32 }
 0x664   : > { %2717 = vmatmul.msk.bf16.vlgmr.msrb.gmra.mxu3 %vm1801_vm14, %v1863_v33  ;;  %2718 = vmatmul.msk.bf16.vlgmr.msrb.gmra.mxu0 %vm1586_vm10, %v3502_v19  ;;  %v2983_v33 = vld [vmem:[%s3693_s3] ss:$0 sm:$0xff]  ;;  %s3698_s3 = sld [smem:[#allocation30_spill]] }
 0x665   : > { %2076 = vmatpush.bf16.msrb.mxu3 %v2866_v17 }
 0x669   : > { %v1859_v34 = vpop.f32.mrf.mxu2 }
 0x6d1   : > { %v1818_v38 = vpop.f32.mrf.mxu0  ;;  %v1837_v39 = vpop.f32.mrf.mxu1 }
 0x6d2   : > { %v1838_v46 = vadd.f32 %v1837_v39, %v1818_v38 }
 0x6d9   : > { %v1839_v40 = vpop.f32.mrf.mxu1  ;;  %v1820_v43 = vpop.f32.mrf.mxu0 }
 0x6e1   : > { %v1893_v44 = vpop.f32.mrf.mxu0 }
 0x6e2   : > { %v1899_v45 = vpack.c.bf16 %v1893_v44, %v1893_v44 }
 0x6e4   : > { %2723 = vmatmul.msk.bf16.vlgmr.msrb.gmra.mxu1 %vm1586_vm10, %v1899_v45  ;;  %v2875_v45 = vld [vmem:[%s3694_s2 + $0x18] sm:$0xff] }
 0x6e7   : > { %v1879_v47 = vpop.f32.mrf.mxu3 }
 0x6e8   : > { %v1883_v48 = vadd.f32 %v1879_v47, %v1838_v46  ;;  %v2874_v46 = vld [vmem:[%s3694_s2 + $0x10] sm:$0xff]  ;;  %v2879_v47 = vld [vmem:[%s3695_s5 + $0x18] sm:$0xff] }
 0x6e9   : > { %v1895_v31 = vpop.f32.mrf.mxu0 }
 0x6ea   : > { %v1930_v49 = vadd.f32 %v2979_v24, %v1883_v48  ;;  %v2873_v24 = vld [vmem:[%s3694_s2 + $0x8] sm:$0xff]  ;;  %v2872_v48 = vld [vmem:[%s3694_s2] sm:$0xff]  ;;  %v2878_v31 = vld [vmem:[%s3695_s5 + $0x10] sm:$0xff] }
 0x6ec   : > { %v1931_v50 = vmax.f32 %v1930_v49, 0.0 }
 0x6ee   : > { %v1933_v51 = vpack.c.bf16 %v1931_v50, %v1931_v50  ;;  %v2984_v50 = vld [vmem:[%s3696_s16] ss:$0 sm:$0xff]  ;;  %s3700_s16 = sld [smem:[#allocation32_spill]] }
 0x6ef   : > { %v1881_v52 = vpop.f32.mrf.mxu3 }
 0x6f0   : > { %2724 = vmatmul.msk.bf16.vlgmr.msra.gmra.mxu2 %vm1801_vm14, %v1933_v51  ;;  %v2985_v51 = vld [vmem:[%s3697_s6] ss:$0 sm:$0xff]  ;;  %s3699_s6 = sld [smem:[#allocation33_spill]] }
 0x761   : > { %v1922_v56 = vpop.f32.mrf.mxu1 }
 0x762   : > { %v1923_v60 = vadd.f32 %v2980_v58, %v1922_v56 }
 0x769   : > { %v1924_v57 = vpop.f32.mrf.mxu1 }
 0x773   : > { %v1953_v61 = vpop.f32.mrf.mxu2 }
 0x774   : > { %v1954_v0 = vadd.f32 %v2981_v59, %v1953_v61  ;;  %v2986_v61 = vld [vmem:[%s3698_s3] ss:$0 sm:$0xff]  ;;  %s1229_s3 = sand.u32 1, %s3046_s10  }
 0x775   : > { %s1230_s2 = scalar_lea.vmem [#allocation2], %s1229_s3  ;;  %s2549_s8 = scalar_lea.sflag [#allocation3], %s1229_s3 }
 0x776   : > { %v1957_v1 = vadd.f32 %v1954_v0, %v1923_v60 }
 0x778   : > { %v1958_v2 = vmax.f32 %v1957_v1, 0.0 }
 0x77a   : > { %v1959_v3 = vpack.c.bf16 %v1958_v2, %v1958_v2 }
 0x77b   : > { %v1955_v4 = vpop.f32.mrf.mxu2 }
 0x77c   : > { %2733 = vmatmul.msk.bf16.vlgmr.msra.gmra.mxu3 %vm1382_vm7, %v1959_v3  ;;  %v2124_v5 = vsel %vm1805_vm11, %v1959_v3, 0 }
 0x77d   : > { %2133 = vmatpush.bf16.msra.mxu2 %v2124_v5  ;;  %2169 = vmatpush.bf16.msra.mxu3 %v2870_v27 }
 0x781   : > { %2170 = vmatpush.bf16.msra.mxu3 %v2869_v28 }
 0x7ff   : > { %v1992_v11 = vpop.f32.mrf.mxu3 }
 0x800   : > { %v1993_v12 = vadd.f32 %v2982_v7, %v1992_v11  ;;  %v2877_v7 = vld [vmem:[%s3695_s5 + $0x8] sm:$0xff]  ;;  %v2876_v11 = vld [vmem:[%s3695_s5] sm:$0xff] }
 0x802   : > { %v1996_v13 = vmax.f32 %v1993_v12, 0.0  ;;  %v2881_v12 = vld [vmem:[%s3695_s5 + $0x28] sm:$0xff] }
 0x804   : > { %v1997_v14 = vpack.c.bf16 %v1996_v13, %v1996_v13  ;;  %v2880_v13 = vld [vmem:[%s3695_s5 + $0x20] sm:$0xff]  ;;  %s2559_s5 = sshll.u32 %s1230_s2, 4  ;;  %s2560_s5 = int_to_ptr.vmem [resolvable:$true] %s2559_s5 }
 0x806   : > { %v2001_v15 = vsel %vm1805_vm11, %v1997_v14, 0 }
 0x807   : > { %v1994_v16 = vpop.f32.mrf.mxu3  ;;  %2010 = vmatpush.bf16.msra.mxu0 %v2001_v15  ;;  %2028 = vmatpush.bf16.msra.mxu1 %v2001_v15 }
 0x80a   : > { %2734 = vmatmul.msk.bf16.vlgmr.msra.gmra.mxu0 %vm1801_vm14, %v3504_v20  ;;  %2735 = vmatmul.msk.bf16.vlgmr.msra.gmra.mxu1 %vm1801_vm14, %v3502_v19 }
 0x80b   : > { %2091 = vmatpush.bf16.msrb.mxu0 %v2001_v15  ;;  %2117 = vmatpush.bf16.msrb.mxu1 %v2868_v6 }
 0x80f   : > { %2205 = vmatpush.bf16.msra.mxu0 %v2871_v42  ;;  %2258 = vmatpush.bf16.msra.mxu1 %v2875_v45 }
 0x813   : > { %2259 = vmatpush.bf16.msra.mxu1 %v2874_v46 }
 0x817   : > { %2260 = vmatpush.bf16.msra.mxu1 %v2873_v24 }
 0x81a   : > { %2748 = vmatmul.msk.bf16.vlgmr.msrb.gmra.mxu0 %vm1801_vm14, %v3513_v23 }
 0x81b   : > { %2334 = vmatpush.bf16.msrb.mxu0 %v2879_v47  ;;  %2261 = vmatpush.bf16.msra.mxu1 %v2872_v48 }
 0x81f   : > { %2335 = vmatpush.bf16.msrb.mxu0 %v2878_v31 }
 0x887   : > { %v2012_v9 = vpop.f32.mrf.mxu0  ;;  %v2030_v18 = vpop.f32.mrf.mxu1 }
 0x888   : > { %v2018_v8 = vpack.c.bf16 %v2012_v9, %v2012_v9  ;;  %v2037_v10 = vpack.c.bf16 %v2030_v18, %v2030_v18 }
 0x88a   : > { %2742 = vmatmul.msk.bf16.vlgmr.msrb.gmra.mxu2 %vm1586_vm10, %v2037_v10  ;;  %2747 = vmatmul.msk.bf16.vlgmr.msrb.gmra.mxu3 %vm1586_vm10, %v2018_v8  ;;  %v2885_v8 = vld [vmem:[%s3302_s20 + $0x18] sm:$0xff]  ;;  %v2884_v10 = vld [vmem:[%s3302_s20 + $0x10] sm:$0xff] }
 0x88f   : > { %v2014_v21 = vpop.f32.mrf.mxu0  ;;  %v2032_v22 = vpop.f32.mrf.mxu1 }
 0x890   : > { %v2883_v21 = vld [vmem:[%s3302_s20 + $0x8] sm:$0xff] }
 0x891   : > { %v2887_v22 = vld [vmem:[%s3699_s6 + $0x8] sm:$0xff] }
 0x897   : > { %v2093_v63 = vpop.f32.mrf.mxu0 }
 0x898   : > { %v2100_v25 = vpack.c.bf16 %v2093_v63, %v2093_v63  ;;  %v2882_v63 = vld [vmem:[%s3302_s20] sm:$0xff] }
 0x89a   : > { %2755 = vmatmul.msk.bf16.vlgmr.msrb.gmra.mxu1 %vm1586_vm10, %v2100_v25  ;;  %2756 = vmatmul.msk.bf16.vlgmr.msra.gmra.mxu2 %vm1801_vm14, %v3502_v19  ;;  %v2886_v25 = vld [vmem:[%s3699_s6] sm:$0xff] }
 0x89b   : > { %2362 = vmatpush.bf16.msrb.mxu1 %v2877_v7 }
 0x89f   : > { %v2095_v26 = vpop.f32.mrf.mxu0  ;;  %2363 = vmatpush.bf16.msrb.mxu1 %v2876_v11 }
 0x90d   : > { %v2056_v41 = vpop.f32.mrf.mxu2  ;;  %v2078_v62 = vpop.f32.mrf.mxu3 }
 0x90e   : > { %v2079_v32 = vadd.f32 %v2078_v62, %v2056_v41 }
 0x915   : > { %v2058_v29 = vpop.f32.mrf.mxu2  ;;  %v2080_v30 = vpop.f32.mrf.mxu3 }
 0x916   : > { %v2987_v29 = vld [vmem:[%s3700_s16] ss:$0 sm:$0xff]  ;;  %s2557_s16 = scalar_lea.hbm %s3312_s4, %s3335_s0  ;;  %s3012_s0 = scalar_lea.hbm %s3312_s4, 2 }
 0x917   : > { %v2119_v34 = vpop.f32.mrf.mxu1  ;;  %s2561_s6 = sshll.u32 %s2557_s16, 4  ;;  %s2562_s6 = int_to_ptr.hbm [resolvable:$true] %s2561_s6 }
 0x918   : > { %v2123_v35 = vadd.f32 %v2119_v34, %v2079_v32  ;;  %s3006_s9 = sshra.s32 %s2562_s6, 4  ;;  %s3007_s9 = int_to_ptr.hbm [resolvable:$true] %s3006_s9 }
 0x919   : > { %p3013_p0 = scmp.lt.s32.totalorder %s3007_s9, %s3312_s4 }
 0x91a   : > { %v2180_v36 = vadd.f32 %v2983_v33, %v2123_v35 }
 0x91c   : > { %v2181_v37 = vmax.f32 %v2180_v36, 0.0 }
 0x91d   : > { %v2135_v38 = vpop.f32.mrf.mxu2 }
 0x91e   : > { %v2184_v39 = vpack.c.bf16 %v2181_v37, %v2181_v37  ;;  %v2143_v40 = vpack.c.bf16 %v2135_v38, %v2135_v38 }
 0x91f   : > { %v2121_v43 = vpop.f32.mrf.mxu1 }
 0x920   : > { %2765 = vmatmul.msk.bf16.vlgmr.msra.gmra.mxu3 %vm1382_vm7, %v2143_v40  ;;  %2770 = vmatmul.msk.bf16.vlgmr.msra.gmra.mxu0 %vm1586_vm10, %v2184_v39  ;;  %v3098_v40 = vmov 2.0   ;;  %v2988_v43 = vld [vmem:[%s3307_s27] ss:$0 sm:$0xff] }
 0x921   : > { %2990 = vrcp.f32 %v3098_v40 }
 0x925   : > { %v2137_v44 = vpop.f32.mrf.mxu2 }
 0x926   : > { %v2989_v44 = vld [vmem:[%s3701_s12] ss:$0 sm:$0xff]  ;;  %s3008_s12 = scalar_lea.hbm %s3007_s9, 1 }
 0x927   : > { %v2991_v45 = vpop.eup %2990  ;;  %p3009_p11 = scmp.ne.s32.totalorder %s3007_s9, %s3008_s12  ;;  %p3014_p1 = scmp.lt.s32.totalorder %s3012_s0, %s3008_s12 }
 0x928   : > { %v2540_v48 = vmul.f32 2.0, %v2991_v45  ;;  %vm2544_vm1 = vweird.f32 %v2991_v45 }
 0x929   : > { %p3010_p12 = pnand %p3009_p11, %p3352_p5  ;;  %p3015_p2 = por %p3014_p1, %p3013_p0 }
 0x92b   : > { %p3011_p13 = pneg %p3010_p12 }
 0x92d   : > { %p3016_p3 = pnand %p3015_p2, %p3011_p13 }
 0x99d   : > { %v2207_v49 = vpop.f32.mrf.mxu0 }
 0x99e   : > { %v2208_v53 = vadd.f32 %v2984_v50, %v2207_v49  ;;  %v2541_v50 = vsub.f32 1.0, %v2540_v48 }
 0x9a3   : > { %v2172_v52 = vpop.f32.mrf.mxu3 }
 0x9a4   : > { %v2173_v54 = vadd.f32 %v2985_v51, %v2172_v52 }
 0x9a5   : > { %v2209_v55 = vpop.f32.mrf.mxu0 }
 0x9a6   : > { %v2211_v56 = vadd.f32 %v2208_v53, %v2173_v54  ;;  %v2542_v54 = vmul.f32 %v2991_v45, %v2541_v50 }
 0x9a8   : > { %v2212_v57 = vmax.f32 %v2211_v56, 0.0 }
 0x9aa   : > { %v2213_v58 = vpack.c.bf16 %v2212_v57, %v2212_v57  ;;  %v2543_v57 = vadd.f32 %v2991_v45, %v2542_v54 }
 0x9ab   : > { %v2174_v59 = vpop.f32.mrf.mxu3 }
 0x9ac   : > { %2787 = vmatmul.msk.bf16.vlgmr.msra.gmra.mxu1 %vm2250_vm15, %v2213_v58  ;;  %v2419_v60 = vsel %vm1298_vm0, %v2213_v58, 0 }
 0x9ad   : > { %2428 = vmatpush.bf16.msra.mxu0 %v2419_v60  ;;  %2478 = vmatpush.bf16.msra.mxu1 %v2885_v8  ;;  %v2545_v60 = vsel %vm2544_vm1, %v2991_v45, %v2543_v57 }
 0x9b1   : > { %2479 = vmatpush.bf16.msra.mxu1 %v2884_v10 }
 0x9b5   : > { %2480 = vmatpush.bf16.msra.mxu1 %v2883_v21 }
 0x9b9   : > { %2481 = vmatpush.bf16.msra.mxu1 %v2882_v63 }
 0xa29   : > { %v2263_v0 = vpop.f32.mrf.mxu1 }
 0xa2a   : > { %v2264_v1 = vadd.f32 %v2986_v61, %v2263_v0 }
 0xa2c   : > { %v2267_v2 = vmax.f32 %v2264_v1, 0.0 }
 0xa2e   : > { %v2268_v3 = vpack.c.bf16 %v2267_v2, %v2267_v2 }
 0xa30   : > { %v2272_v4 = vsel %vm1298_vm0, %v2268_v3, 0 }
 0xa31   : > { %v2265_v5 = vpop.f32.mrf.mxu1  ;;  %2281 = vmatpush.bf16.msrb.mxu2 %v2272_v4  ;;  %2301 = vmatpush.bf16.msrb.mxu3 %v2272_v4 }
 0xa34   : > { %2788 = vmatmul.msk.bf16.vlgmr.msrb.gmra.mxu2 %vm1406_vm8, %v3504_v20  ;;  %2789 = vmatmul.msk.bf16.vlgmr.msrb.gmra.mxu3 %vm1406_vm8, %v3502_v19 }
 0xa35   : > { %2378 = vmatpush.bf16.msra.mxu2 %v2272_v4  ;;  %2411 = vmatpush.bf16.msra.mxu3 %v2881_v12 }
 0xa39   : > { %2412 = vmatpush.bf16.msra.mxu3 %v2880_v13  ;;  %2523 = vmatpush.bf16.msrb.mxu2 %v2887_v22 }
 0xa3d   : > { %2524 = vmatpush.bf16.msrb.mxu2 %v2886_v25 }
 0xa44   : > { %2812 = vmatmul.msk.bf16.vlgmr.msra.gmra.mxu2 %vm1406_vm8, %v3513_v23 }
 0xab7   : > { %v2283_v14 = vpop.f32.mrf.mxu2  ;;  %v2303_v15 = vpop.f32.mrf.mxu3 }
 0xab8   : > { %v2291_v20 = vpack.c.bf16 %v2283_v14, %v2283_v14  ;;  %v2312_v16 = vpack.c.bf16 %v2303_v15, %v2303_v15 }
 0xaba   : > { %2811 = vmatmul.msk.bf16.vlgmr.msrb.gmra.mxu1 %vm1382_vm7, %v2291_v20  ;;  %2802 = vmatmul.msk.bf16.vlgmr.msrb.gmra.mxu0 %vm1382_vm7, %v2312_v16 }
 0xabf   : > { %v2285_v23 = vpop.f32.mrf.mxu2  ;;  %v2305_v17 = vpop.f32.mrf.mxu3 }
 0xac7   : > { %v2380_v6 = vpop.f32.mrf.mxu2 }
 0xac8   : > { %v2389_v9 = vpack.c.bf16 %v2380_v6, %v2380_v6 }
 0xaca   : > { %2825 = vmatmul.msk.bf16.vlgmr.msra.gmra.mxu3 %vm1382_vm7, %v2389_v9  ;;  %2826 = vmatmul.msk.bf16.vlgmr.msra.gmra.mxu0 %vm1406_vm8, %v3502_v19 }
 0xacf   : > { %v2382_v18 = vpop.f32.mrf.mxu2 }
 0xb37   : > { %v2365_v26 = vpop.f32.mrf.mxu1  ;;  %v2337_v27 = vpop.f32.mrf.mxu0 }
 0xb38   : > { %v2366_v62 = vadd.f32 %v2365_v26, %v2337_v27 }
 0xb3f   : > { %v2367_v28 = vpop.f32.mrf.mxu1  ;;  %v2339_v42 = vpop.f32.mrf.mxu0 }
 0xb47   : > { %v2430_v41 = vpop.f32.mrf.mxu0 }
 0xb48   : > { %v2442_v19 = vpack.c.bf16 %v2430_v41, %v2430_v41 }
 0xb4a   : > { %2843 = vmatmul.msk.bf16.vlgmr.msra.gmra.mxu1 %vm2250_vm15, %v2442_v19 }
 0xb4d   : > { %v2414_v30 = vpop.f32.mrf.mxu3 }
 0xb4e   : > { %v2418_v32 = vadd.f32 %v2414_v30, %v2366_v62 }
 0xb4f   : > { %v2432_v33 = vpop.f32.mrf.mxu0 }
 0xb50   : > { %v2491_v34 = vadd.f32 %v2987_v29, %v2418_v32 }
 0xb52   : > { %v2492_v35 = vmax.f32 %v2491_v34, 0.0 }
 0xb54   : > { %v2497_v36 = vpack.c.bf16 %v2492_v35, %v2492_v35 }
 0xb55   : > { %v2416_v37 = vpop.f32.mrf.mxu3 }
 0xb56   : > { %2852 = vmatmul.msk.bf16.vlgmr.msrb.gmra.mxu2 %vm1382_vm7, %v2497_v36 }
 0xbc7   : > { %v2483_v38 = vpop.f32.mrf.mxu1 }
 0xbc8   : > { %v2484_v46 = vadd.f32 %v2988_v43, %v2483_v38 }
 0xbcf   : > { %v2485_v39 = vpop.f32.mrf.mxu1 }
 0xbd9   : > { %v2526_v24 = vpop.f32.mrf.mxu2 }
 0xbda   : > { %v2527_v47 = vadd.f32 %v2989_v44, %v2526_v24 }
 0xbdc   : > { %v2530_v31 = vadd.f32 %v2527_v47, %v2484_v46 }
 0xbde   : > { %v2531_v49 = vmax.f32 %v2530_v31, 0.0 }
 0xbe0   : > { %v2532_v51 = vsel %vm1298_vm0, %v2531_v49, 0.0 }
 0xbe1   : > { %v2533_v52 = vrot.slane %v2532_v51, 4  ;;  %v2528_v53 = vpop.f32.mrf.mxu2 }
 0xbe3   : > { %v2534_v55 = vadd.f32 %v2533_v52, %v2532_v51 }
 0xbe5   : > { %v2535_v56 = vrot.slane %v2534_v55, 2 }
 0xbe7   : > { %v2536_v58 = vadd.f32 %v2535_v56, %v2534_v55 }
 0xbe9   : > { %v2537_v59 = vrot.slane %v2536_v58, 1 }
 0xbeb   : > { %v2538_v61 = vadd.f32 %v2537_v59, %v2536_v58 }
 0xbed   : > { %v2546_v0 = vmul.f32 %v2545_v60, %v2538_v61 }
 0xbef   : > { %2547 = vst [vmem:[%s1230_s2] sm:$0x1] %v2546_v0 }
 0xbf0   : > { %3019 = shalt.err (!%p3016_p3)
}
 0xbf1   : > { %2888 = dma.vmem_to_hbm [thread:$0]  (%p3352_p5), %s2560_s5, 16, %s2562_s6, %s2549_s8  }
 0xbf2 PF: > { %p2894_p4 = scmp.ge.s32.totalorder %s3054_s15, 2  ;;  %s2573_s2 = sand.u32 1, %s3042_s7  }
 0xbf3   : > { %s2574_s3 = scalar_lea.sflag [#allocation3], %s2573_s2 }
 0xbf4   : > { %p2891_p7 = pnand %p2894_p4, %p3356_p6 }
 0xbf6   : > { %p2892_p8 = pneg %p2891_p7 }
 0xbf8   : > { %3037 = dma.done.wait (%p2892_p8), %s2574_s3, 16  }
 0xbf9   : > { %3039 = vsyncadd (%p2892_p8), %s2574_s3, 4294967280  ;;  %p93_p9 = scmp.ge.s32.totalorder %s3339_s18, 4   ;;  %s3702_s7 = smov %s3046_s10 }
 0xbfa   : > { %s3703_s10 = smov %s3050_s11  ;;  %s3704_s11 = smov %s3350_s26 }
 0xbfb   : > { %s3705_s15 = smov %s3339_s18  ;;  %95 = sbr.rel (!%p93_p9) target bundleno = 89 (0x59), region = 270 }
 0xc00   :  { %2579 = vsyncpa [#allocation3], 1 }
 0xc01   :  { %2581 = vsyncpa [#allocation3 + $0x1], 1 }

</bundles_post_ra>
